<compile_context>
chip_gen: v5e
topology: v5e:2x2
jax: 0.10.0
libtpu: 0.0.40
codegen_flags: <defaults>
</compile_context>

<pallas_src>
import jax
import jax.numpy as jnp
from jax.experimental import pallas as pl
from jax.experimental.pallas import tpu as pltpu


# ---------------------------------------------------------------------------
# Tiling helpers
# ---------------------------------------------------------------------------

def _pick_tile(dim, max_tile, align):
    """Largest multiple of `align` that divides `dim`, capped at `max_tile`.
    Falls back to the full dim (block == array dim is always allowed)."""
    best = None
    t = align
    while t <= min(dim, max_tile):
        if dim % t == 0:
            best = t
        t += align
    return best if best is not None else dim


# ---------------------------------------------------------------------------
# Kernel 1 & 3: tiled  out = x @ w + b   (fully parallel grid)
# ---------------------------------------------------------------------------

def matmul_bias_kernel(x_ref, w_ref, b_ref, o_ref):
    o_ref[...] = (jnp.dot(x_ref[...], w_ref[...],
                          preferred_element_type=jnp.float32)
                  + b_ref[...]).astype(o_ref.dtype)


def _matmul_bias(x, w, b, out_dtype):
    """x: (M, K), w: (K, N), b: (1, N)  ->  (M, N) in out_dtype."""
    M, K = x.shape
    N = w.shape[1]
    tm = _pick_tile(M, 512, 8)     # sublane-aligned row tile
    tn = _pick_tile(N, 2048, 128)  # lane-dense column tile (multiple of 128)
    grid = (M // tm, N // tn)
    return pl.pallas_call(
        matmul_bias_kernel,
        out_shape=jax.ShapeDtypeStruct((M, N), out_dtype),
        grid_spec=pltpu.PrefetchScalarGridSpec(
            num_scalar_prefetch=0,
            grid=grid,
            in_specs=[
                pl.BlockSpec((tm, K), lambda i, j: (i, 0)),
                pl.BlockSpec((K, tn), lambda i, j: (0, j)),
                pl.BlockSpec((1, tn), lambda i, j: (0, j)),
            ],
            out_specs=pl.BlockSpec((tm, tn), lambda i, j: (i, j)),
        ),
        compiler_params=pltpu.CompilerParams(
            dimension_semantics=("parallel", "parallel")),
    )(x, w, b)


# ---------------------------------------------------------------------------
# Kernel 2: the serial GRU recurrence (only the h-dependent matmul remains)
# ---------------------------------------------------------------------------

def gru_recurrent_kernel(h0_ref, xp_ref, w_h_ref, b_hn_ref,
                         hs_ref, h_last_ref, h_scr):
    """Processes T timesteps per grid step.

    xp_ref : (T, B, 3H) f32 precomputed  x @ [W_ir|W_iz|W_in] + (b_i + b_h[r,z]) .
    w_h_ref: (H, 3H)    bf16 fused hidden-to-hidden weights [W_hr|W_hz|W_hn].
    b_hn_ref: (1, H)    f32 hidden-side bias of the n gate (kept separate: r gates it).
    hs_ref : (T, B, H)  bf16 per-step hidden states (fed to the output GEMM).
    h_last_ref: (B, H)  f32 final hidden state (written on the last grid step only).
    """
    blk = pl.program_id(0)

    @pl.when(blk == 0)
    def _():
        h_scr[...] = h0_ref[...]

    T = xp_ref.shape[0]
    H = h_scr.shape[1]

    w_h = w_h_ref[...]        # hoist constant loads out of the unrolled loop
    b_hn = b_hn_ref[...]

    for j in range(T):        # static trip count -> fully unrolled
        h_prev = h_scr[...]                                   # (B, H) f32
        gates_h = jnp.dot(h_prev.astype(w_h.dtype), w_h,
                          preferred_element_type=jnp.float32)  # (B, 3H)
        xp_t = xp_ref[j]                                       # (B, 3H)

        r = jax.nn.sigmoid(xp_t[:, 0:H] + gates_h[:, 0:H])
        z = jax.nn.sigmoid(xp_t[:, H:2 * H] + gates_h[:, H:2 * H])
        n = jnp.tanh(xp_t[:, 2 * H:3 * H]
                     + r * (gates_h[:, 2 * H:3 * H] + b_hn))
        h_new = (1.0 - z) * n + z * h_prev

        h_scr[...] = h_new
        hs_ref[j] = h_new.astype(hs_ref.dtype)

    @pl.when(blk == pl.num_programs(0) - 1)
    def _():
        h_last_ref[...] = h_scr[...]


# ---------------------------------------------------------------------------
# Forward pass (mirrors Decoder.forward)
# ---------------------------------------------------------------------------

def decoder_forward(params, inputs, encoder_output=None, encoder_mask=None,
                    hidden=None):
    """encoder_output / encoder_mask are unused by the reference module's
    forward and are accepted only for signature parity."""
    emb = jnp.take(params["emb"], inputs, axis=0)      # (S, B, E) f32
    S, B, E = emb.shape
    H = params["w_h"].shape[0]
    V = params["w_out"].shape[1]

    if hidden is None:
        h0 = jnp.zeros((B, H), jnp.float32)
    else:
        h0 = hidden.reshape(B, H).astype(jnp.float32)

    # ---- 1) hoisted input projection: one big parallel GEMM -----------------
    xp = _matmul_bias(emb.reshape(S * B, E).astype(jnp.bfloat16),
                      params["w_x"], params["b_x"], jnp.float32)
    xp = xp.reshape(S, B, 3 * H)

    # ---- 2) serial recurrence, T timesteps per grid step ---------------------
    T = _pick_tile(S, 32, 1)          # largest block of timesteps dividing S
    hs, h_last = pl.pallas_call(
        gru_recurrent_kernel,
        out_shape=(
            jax.ShapeDtypeStruct((S, B, H), jnp.bfloat16),   # all hidden states
            jax.ShapeDtypeStruct((B, H), jnp.float32),       # final hidden
        ),
        grid_spec=pltpu.PrefetchScalarGridSpec(
            num_scalar_prefetch=0,
            grid=(S // T,),
            in_specs=[
                pl.BlockSpec((B, H), lambda i: (0, 0)),          # h0
                pl.BlockSpec((T, B, 3 * H), lambda i: (i, 0, 0)),  # xp block
                pl.BlockSpec((H, 3 * H), lambda i: (0, 0)),      # fused W_h
                pl.BlockSpec((1, H), lambda i: (0, 0)),          # b_hn
            ],
            out_specs=(
                pl.BlockSpec((T, B, H), lambda i: (i, 0, 0)),    # hidden states
                pl.BlockSpec((B, H), lambda i: (0, 0)),          # final hidden
            ),
            scratch_shapes=[pltpu.VMEM((B, H), jnp.float32)],
        ),
        compiler_params=pltpu.CompilerParams(
            dimension_semantics=("arbitrary",)),  # sequential recurrence
    )(h0, xp, params["w_h"], params["b_hn"])

    # ---- 3) hoisted output Linear: one big parallel GEMM, tiled over V -------
    logits = _matmul_bias(hs.reshape(S * B, H),
                          params["w_out"], params["b_out"], jnp.float32)
    logits = logits.reshape(S, B, V)

    return logits, h_last[None]   # hidden shape (num_layers=1, B, H)


# ---------------------------------------------------------------------------
# Parameters (fused / pre-transposed layouts, bf16 weights)
# ---------------------------------------------------------------------------

def init_params(key, vocab_size, emb_dim, hidden_dim):
    ks = jax.random.split(key, 16)
    s = 1.0 / float(hidden_dim) ** 0.5

    def u(k, shape):
        return jax.random.uniform(k, shape, jnp.float32, -s, s)

    w_ir, w_iz, w_in = (u(ks[1], (emb_dim, hidden_dim)),
                        u(ks[2], (emb_dim, hidden_dim)),
                        u(ks[3], (emb_dim, hidden_dim)))
    w_hr, w_hz, w_hn = (u(ks[4], (hidden_dim, hidden_dim)),
                        u(ks[5], (hidden_dim, hidden_dim)),
                        u(ks[6], (hidden_dim, hidden_dim)))
    b_ir, b_iz, b_in = (u(ks[7], (1, hidden_dim)),
                        u(ks[8], (1, hidden_dim)),
                        u(ks[9], (1, hidden_dim)))
    b_hr, b_hz, b_hn = (u(ks[10], (1, hidden_dim)),
                        u(ks[11], (1, hidden_dim)),
                        u(ks[12], (1, hidden_dim)))
    w_out = u(ks[13], (hidden_dim, vocab_size))
    b_out = u(ks[14], (1, vocab_size))

    return {
        "emb": jax.random.normal(ks[0], (vocab_size, emb_dim), jnp.float32),
        # fused input-to-hidden weights (E, 3H), gate order r|z|n, bf16
        "w_x": jnp.concatenate([w_ir, w_iz, w_in], axis=1).astype(jnp.bfloat16),
        # input-side bias with hidden-side r/z biases folded in (they're additive);
        # b_hn stays separate because r gates only the hidden-side term of n.
        "b_x": jnp.concatenate([b_ir + b_hr, b_iz + b_hz, b_in], axis=1),
        # fused hidden-to-hidden weights (H, 3H), bf16
        "w_h": jnp.concatenate([w_hr, w_hz, w_hn], axis=1).astype(jnp.bfloat16),
        "b_hn": b_hn,
        # output Linear, pre-transposed to (H, V), bf16
        "w_out": w_out.astype(jnp.bfloat16),
        "b_out": b_out,
    }


# ---------------------------------------------------------------------------
# Pure-JAX reference (same bf16-matmul / f32-accumulate policy as the kernels)
# ---------------------------------------------------------------------------

def ref_forward(params, inputs, hidden=None):
    emb = jnp.take(params["emb"], inputs, axis=0).astype(jnp.bfloat16)
    S, B, E = emb.shape
    H = params["w_h"].shape[0]
    V = params["w_out"].shape[1]

    xp = (jnp.dot(emb.reshape(S * B, E), params["w_x"],
                  preferred_element_type=jnp.float32)
          + params["b_x"]).reshape(S, B, 3 * H)

    h = (jnp.zeros((B, H), jnp.float32) if hidden is None
         else hidden.reshape(B, H).astype(jnp.float32))

    def step(h, xp_t):
        g = jnp.dot(h.astype(jnp.bfloat16), params["w_h"],
                    preferred_element_type=jnp.float32)
        r = jax.nn.sigmoid(xp_t[:, 0:H] + g[:, 0:H])
        z = jax.nn.sigmoid(xp_t[:, H:2 * H] + g[:, H:2 * H])
        n = jnp.tanh(xp_t[:, 2 * H:3 * H]
                     + r * (g[:, 2 * H:3 * H] + params["b_hn"]))
        h_new = (1.0 - z) * n + z * h
        return h_new, h_new.astype(jnp.bfloat16)

    h_last, hs = jax.lax.scan(step, h, xp)
    logits = (jnp.dot(hs.reshape(S * B, H), params["w_out"],
                      preferred_element_type=jnp.float32)
              + params["b_out"]).reshape(S, B, V)
    return logits, h_last[None]


if __name__ == "__main__":
    key = jax.random.PRNGKey(0)
    # Small but hardware-friendly shapes: B=8 (sublane), E/H multiples of 128
    # (lane / MXU aligned), V multiple of 128 (lane-dense logits stores).
    vocab_size, emb_dim, hidden_dim = 256, 128, 128
    S, B = 8, 8

    kp, ki = jax.random.split(key)
    params = init_params(kp, vocab_size, emb_dim, hidden_dim)
    inputs = jax.random.randint(ki, (S, B), 0, vocab_size, dtype=jnp.int32)

    # Unused by the reference module's forward; passed for signature parity.
    encoder_output = jnp.zeros((S, B, hidden_dim), jnp.float32)
    encoder_mask = jnp.ones((S, B), jnp.float32)

    fwd = jax.jit(decoder_forward)
    logits, hidden = fwd(params, inputs, encoder_output, encoder_mask)
    jax.block_until_ready((logits, hidden))

    ref_logits, ref_hidden = ref_forward(params, inputs)
    assert logits.shape == (S, B, vocab_size)
    assert hidden.shape == (1, B, hidden_dim)
    assert jnp.allclose(logits, ref_logits, atol=1e-2, rtol=1e-2), \
        float(jnp.max(jnp.abs(logits - ref_logits)))
    assert jnp.allclose(hidden, ref_hidden, atol=1e-2, rtol=1e-2), \
        float(jnp.max(jnp.abs(hidden - ref_hidden)))

    print("KERNEL_OK")
</pallas_src>

<mosaic_0001>
module attributes {stable_mosaic.version = 11 : i64} {
  func.func @matmul_bias_kernel(%arg0: i32, %arg1: i32, %arg2: memref<64x128xbf16, #tpu.memory_space<vmem>>, %arg3: memref<128x384xbf16, #tpu.memory_space<vmem>>, %arg4: memref<1x384xf32, #tpu.memory_space<vmem>>, %arg5: memref<64x384xf32, #tpu.memory_space<vmem>>) attributes {dimension_semantics = [#tpu.dimension_semantics<parallel>, #tpu.dimension_semantics<parallel>], iteration_bounds = array<i64: 1, 1>, scalar_prefetch = 0 : i64, scratch_operands = 0 : i64, tpu.core_type = #tpu.core_type<tc>, window_params = [{transform_indices = @transform_0, window_bounds = array<i64: 64, 128>}, {transform_indices = @transform_1, window_bounds = array<i64: 128, 384>}, {transform_indices = @transform_2, window_bounds = array<i64: 1, 384>}, {transform_indices = @transform_3, window_bounds = array<i64: 64, 384>}]} {
    %c0 = arith.constant 0 : index
    %c0_0 = arith.constant 0 : index
    %0 = vector.load %arg2[%c0, %c0_0] : memref<64x128xbf16, #tpu.memory_space<vmem>>, vector<64x128xbf16>
    %c0_1 = arith.constant 0 : index
    %c0_2 = arith.constant 0 : index
    %1 = vector.load %arg3[%c0_1, %c0_2] : memref<128x384xbf16, #tpu.memory_space<vmem>>, vector<128x384xbf16>
    %cst = arith.constant dense<0.000000e+00> : vector<64x384xf32>
    %2 = tpu.matmul %0, %1, %cst {dimension_numbers = #tpu.dot_dimension_numbers<[1], [0], [0], [1], [0, 0, 1, 1], [], []>} : vector<64x128xbf16>, vector<128x384xbf16>, vector<64x384xf32> -> vector<64x384xf32>
    %c0_3 = arith.constant 0 : index
    %c0_4 = arith.constant 0 : index
    %3 = vector.load %arg4[%c0_3, %c0_4] : memref<1x384xf32, #tpu.memory_space<vmem>>, vector<1x384xf32>
    %4 = vector.broadcast %3 : vector<1x384xf32> to vector<64x384xf32>
    %5 = arith.addf %2, %4 : vector<64x384xf32>
    %c0_5 = arith.constant 0 : index
    %c0_6 = arith.constant 0 : index
    %6 = vector.load %arg5[%c0_5, %c0_6] : memref<64x384xf32, #tpu.memory_space<vmem>>, vector<64x384xf32>
    tpu.vector_store %arg5[%c0_5, %c0_6], %5 {strides = array<i32>} : memref<64x384xf32, #tpu.memory_space<vmem>>, vector<64x384xf32>,
    return
  }
  func.func @transform_0(%arg0: i32, %arg1: i32) -> (i32, i32) {
    %c0_i32 = arith.constant 0 : i32
    %c0_i32_0 = arith.constant 0 : i32
    return %arg0, %c0_i32 : i32, i32
  }
  func.func @transform_1(%arg0: i32, %arg1: i32) -> (i32, i32) {
    %c0_i32 = arith.constant 0 : i32
    %c0_i32_0 = arith.constant 0 : i32
    return %c0_i32, %arg1 : i32, i32
  }
  func.func @transform_2(%arg0: i32, %arg1: i32) -> (i32, i32) {
    %c0_i32 = arith.constant 0 : i32
    %c0_i32_0 = arith.constant 0 : i32
    return %c0_i32, %arg1 : i32, i32
  }
  func.func @transform_3(%arg0: i32, %arg1: i32) -> (i32, i32) {
    %c0_i32 = arith.constant 0 : i32
    return %arg0, %arg1 : i32, i32
  }
}

module attributes {stable_mosaic.version = 11 : i64} {
  func.func @matmul_bias_kernel(%arg0: i32, %arg1: i32, %arg2: memref<64x128xbf16, #tpu.memory_space<vmem>>, %arg3: memref<128x256xbf16, #tpu.memory_space<vmem>>, %arg4: memref<1x256xf32, #tpu.memory_space<vmem>>, %arg5: memref<64x256xf32, #tpu.memory_space<vmem>>) attributes {dimension_semantics = [#tpu.dimension_semantics<parallel>, #tpu.dimension_semantics<parallel>], iteration_bounds = array<i64: 1, 1>, scalar_prefetch = 0 : i64, scratch_operands = 0 : i64, tpu.core_type = #tpu.core_type<tc>, window_params = [{transform_indices = @transform_0, window_bounds = array<i64: 64, 128>}, {transform_indices = @transform_1, window_bounds = array<i64: 128, 256>}, {transform_indices = @transform_2, window_bounds = array<i64: 1, 256>}, {transform_indices = @transform_3, window_bounds = array<i64: 64, 256>}]} {
    %c0 = arith.constant 0 : index
    %c0_0 = arith.constant 0 : index
    %0 = vector.load %arg2[%c0, %c0_0] : memref<64x128xbf16, #tpu.memory_space<vmem>>, vector<64x128xbf16>
    %c0_1 = arith.constant 0 : index
    %c0_2 = arith.constant 0 : index
    %1 = vector.load %arg3[%c0_1, %c0_2] : memref<128x256xbf16, #tpu.memory_space<vmem>>, vector<128x256xbf16>
    %cst = arith.constant dense<0.000000e+00> : vector<64x256xf32>
    %2 = tpu.matmul %0, %1, %cst {dimension_numbers = #tpu.dot_dimension_numbers<[1], [0], [0], [1], [0, 0, 1, 1], [], []>} : vector<64x128xbf16>, vector<128x256xbf16>, vector<64x256xf32> -> vector<64x256xf32>
    %c0_3 = arith.constant 0 : index
    %c0_4 = arith.constant 0 : index
    %3 = vector.load %arg4[%c0_3, %c0_4] : memref<1x256xf32, #tpu.memory_space<vmem>>, vector<1x256xf32>
    %4 = vector.broadcast %3 : vector<1x256xf32> to vector<64x256xf32>
    %5 = arith.addf %2, %4 : vector<64x256xf32>
    %c0_5 = arith.constant 0 : index
    %c0_6 = arith.constant 0 : index
    %6 = vector.load %arg5[%c0_5, %c0_6] : memref<64x256xf32, #tpu.memory_space<vmem>>, vector<64x256xf32>
    tpu.vector_store %arg5[%c0_5, %c0_6], %5 {strides = array<i32>} : memref<64x256xf32, #tpu.memory_space<vmem>>, vector<64x256xf32>,
    return
  }
  func.func @transform_0(%arg0: i32, %arg1: i32) -> (i32, i32) {
    %c0_i32 = arith.constant 0 : i32
    %c0_i32_0 = arith.constant 0 : i32
    return %arg0, %c0_i32 : i32, i32
  }
  func.func @transform_1(%arg0: i32, %arg1: i32) -> (i32, i32) {
    %c0_i32 = arith.constant 0 : i32
    %c0_i32_0 = arith.constant 0 : i32
    return %c0_i32, %arg1 : i32, i32
  }
  func.func @transform_2(%arg0: i32, %arg1: i32) -> (i32, i32) {
    %c0_i32 = arith.constant 0 : i32
    %c0_i32_0 = arith.constant 0 : i32
    return %c0_i32, %arg1 : i32, i32
  }
  func.func @transform_3(%arg0: i32, %arg1: i32) -> (i32, i32) {
    %c0_i32 = arith.constant 0 : i32
    return %arg0, %arg1 : i32, i32
  }
}

module attributes {stable_mosaic.version = 11 : i64} {
  func.func @gru_recurrent_kernel(%arg0: i32, %arg1: memref<8x128xf32, #tpu.memory_space<vmem>>, %arg2: memref<8x8x384xf32, #tpu.memory_space<vmem>>, %arg3: memref<128x384xbf16, #tpu.memory_space<vmem>>, %arg4: memref<1x128xf32, #tpu.memory_space<vmem>>, %arg5: memref<8x8x128xbf16, #tpu.memory_space<vmem>>, %arg6: memref<8x128xf32, #tpu.memory_space<vmem>>, %arg7: memref<8x128xf32, #tpu.memory_space<vmem>>) attributes {dimension_semantics = [#tpu.dimension_semantics<arbitrary>], iteration_bounds = array<i64: 1>, scalar_prefetch = 0 : i64, scratch_operands = 1 : i64, tpu.core_type = #tpu.core_type<tc>, window_params = [{pipeline_mode = #tpu.pipeline_mode<synchronous>, transform_indices = @transform_0, window_bounds = array<i64: 8, 128>}, {transform_indices = @transform_1, window_bounds = array<i64: 8, 8, 384>}, {pipeline_mode = #tpu.pipeline_mode<synchronous>, transform_indices = @transform_2, window_bounds = array<i64: 128, 384>}, {pipeline_mode = #tpu.pipeline_mode<synchronous>, transform_indices = @transform_3, window_bounds = array<i64: 1, 128>}, {transform_indices = @transform_4, window_bounds = array<i64: 8, 8, 128>}, {pipeline_mode = #tpu.pipeline_mode<synchronous>, transform_indices = @transform_5, window_bounds = array<i64: 8, 128>}]} {
    %c0_i32 = arith.constant 0 : i32
    %0 = arith.cmpi eq, %arg0, %c0_i32 : i32
    %1 = arith.extui %0 : i1 to i32
    %c0_i32_0 = arith.constant 0 : i32
    %2 = arith.cmpi ne, %1, %c0_i32_0 : i32
    scf.if %2 {
      %c0_110 = arith.constant 0 : index
      %c0_111 = arith.constant 0 : index
      %312 = vector.load %arg1[%c0_110, %c0_111] : memref<8x128xf32, #tpu.memory_space<vmem>>, vector<8x128xf32>
      %c0_112 = arith.constant 0 : index
      %c0_113 = arith.constant 0 : index
      %313 = vector.load %arg7[%c0_112, %c0_113] : memref<8x128xf32, #tpu.memory_space<vmem>>, vector<8x128xf32>
      tpu.vector_store %arg7[%c0_112, %c0_113], %312 {strides = array<i32>} : memref<8x128xf32, #tpu.memory_space<vmem>>, vector<8x128xf32>,
    } else {
    }
    %c0 = arith.constant 0 : index
    %c0_1 = arith.constant 0 : index
    %3 = vector.load %arg3[%c0, %c0_1] : memref<128x384xbf16, #tpu.memory_space<vmem>>, vector<128x384xbf16>
    %c0_2 = arith.constant 0 : index
    %c0_3 = arith.constant 0 : index
    %4 = vector.load %arg4[%c0_2, %c0_3] : memref<1x128xf32, #tpu.memory_space<vmem>>, vector<1x128xf32>
    %c0_4 = arith.constant 0 : index
    %c0_5 = arith.constant 0 : index
    %5 = vector.load %arg7[%c0_4, %c0_5] : memref<8x128xf32, #tpu.memory_space<vmem>>, vector<8x128xf32>
    %6 = arith.truncf %5 : vector<8x128xf32> to vector<8x128xbf16>
    %cst = arith.constant dense<0.000000e+00> : vector<8x384xf32>
    %7 = tpu.matmul %6, %3, %cst {dimension_numbers = #tpu.dot_dimension_numbers<[1], [0], [0], [1], [0, 0, 1, 1], [], []>} : vector<8x128xbf16>, vector<128x384xbf16>, vector<8x384xf32> -> vector<8x384xf32>
    %c0_6 = arith.constant 0 : index
    %c0_7 = arith.constant 0 : index
    %c0_8 = arith.constant 0 : index
    %8 = vector.load %arg2[%c0_6, %c0_7, %c0_8] : memref<8x8x384xf32, #tpu.memory_space<vmem>>, vector<1x8x384xf32>
    %9 = vector.shape_cast %8 : vector<1x8x384xf32> to vector<8x384xf32>
    %10 = vector.extract_strided_slice %9 {offsets = [0, 0], sizes = [8, 128], strides = [1, 1]} : vector<8x384xf32> to vector<8x128xf32>
    %11 = vector.extract_strided_slice %7 {offsets = [0, 0], sizes = [8, 128], strides = [1, 1]} : vector<8x384xf32> to vector<8x128xf32>
    %12 = arith.addf %10, %11 : vector<8x128xf32>
    %13 = arith.negf %12 : vector<8x128xf32>
    %14 = math.exp %13 : vector<8x128xf32>
    %cst_9 = arith.constant 1.000000e+00 : f32
    %15 = vector.broadcast %cst_9 : f32 to vector<8x128xf32>
    %16 = arith.addf %15, %14 : vector<8x128xf32>
    %17 = arith.divf %15, %16 : vector<8x128xf32>
    %18 = vector.extract_strided_slice %9 {offsets = [0, 128], sizes = [8, 128], strides = [1, 1]} : vector<8x384xf32> to vector<8x128xf32>
    %19 = vector.extract_strided_slice %7 {offsets = [0, 128], sizes = [8, 128], strides = [1, 1]} : vector<8x384xf32> to vector<8x128xf32>
    %20 = arith.addf %18, %19 : vector<8x128xf32>
    %21 = arith.negf %20 : vector<8x128xf32>
    %22 = math.exp %21 : vector<8x128xf32>
    %cst_10 = arith.constant 1.000000e+00 : f32
    %23 = vector.broadcast %cst_10 : f32 to vector<8x128xf32>
    %24 = arith.addf %23, %22 : vector<8x128xf32>
    %25 = arith.divf %23, %24 : vector<8x128xf32>
    %26 = vector.extract_strided_slice %9 {offsets = [0, 256], sizes = [8, 128], strides = [1, 1]} : vector<8x384xf32> to vector<8x128xf32>
    %27 = vector.extract_strided_slice %7 {offsets = [0, 256], sizes = [8, 128], strides = [1, 1]} : vector<8x384xf32> to vector<8x128xf32>
    %28 = vector.broadcast %4 : vector<1x128xf32> to vector<8x128xf32>
    %29 = arith.addf %27, %28 : vector<8x128xf32>
    %30 = arith.mulf %17, %29 : vector<8x128xf32>
    %31 = arith.addf %26, %30 : vector<8x128xf32>
    %32 = math.tanh %31 : vector<8x128xf32>
    %cst_11 = arith.constant 1.000000e+00 : f32
    %33 = vector.broadcast %cst_11 : f32 to vector<8x128xf32>
    %34 = arith.subf %33, %25 : vector<8x128xf32>
    %35 = arith.mulf %34, %32 : vector<8x128xf32>
    %36 = arith.mulf %25, %5 : vector<8x128xf32>
    %37 = arith.addf %35, %36 : vector<8x128xf32>
    %c0_12 = arith.constant 0 : index
    %c0_13 = arith.constant 0 : index
    %38 = vector.load %arg7[%c0_12, %c0_13] : memref<8x128xf32, #tpu.memory_space<vmem>>, vector<8x128xf32>
    tpu.vector_store %arg7[%c0_12, %c0_13], %37 {strides = array<i32>} : memref<8x128xf32, #tpu.memory_space<vmem>>, vector<8x128xf32>,
    %39 = arith.truncf %37 : vector<8x128xf32> to vector<8x128xbf16>
    %c0_14 = arith.constant 0 : index
    %c0_15 = arith.constant 0 : index
    %c0_16 = arith.constant 0 : index
    %40 = vector.load %arg5[%c0_14, %c0_15, %c0_16] : memref<8x8x128xbf16, #tpu.memory_space<vmem>>, vector<1x8x128xbf16>
    %41 = vector.shape_cast %40 : vector<1x8x128xbf16> to vector<8x128xbf16>
    %42 = vector.shape_cast %39 : vector<8x128xbf16> to vector<1x8x128xbf16>
    tpu.vector_store %arg5[%c0_14, %c0_15, %c0_16], %42 {strides = array<i32>} : memref<8x8x128xbf16, #tpu.memory_space<vmem>>, vector<1x8x128xbf16>,
    %c0_17 = arith.constant 0 : index
    %c0_18 = arith.constant 0 : index
    %43 = vector.load %arg7[%c0_17, %c0_18] : memref<8x128xf32, #tpu.memory_space<vmem>>, vector<8x128xf32>
    %44 = arith.truncf %43 : vector<8x128xf32> to vector<8x128xbf16>
    %cst_19 = arith.constant dense<0.000000e+00> : vector<8x384xf32>
    %45 = tpu.matmul %44, %3, %cst_19 {dimension_numbers = #tpu.dot_dimension_numbers<[1], [0], [0], [1], [0, 0, 1, 1], [], []>} : vector<8x128xbf16>, vector<128x384xbf16>, vector<8x384xf32> -> vector<8x384xf32>
    %c1 = arith.constant 1 : index
    %c0_20 = arith.constant 0 : index
    %c0_21 = arith.constant 0 : index
    %46 = vector.load %arg2[%c1, %c0_20, %c0_21] : memref<8x8x384xf32, #tpu.memory_space<vmem>>, vector<1x8x384xf32>
    %47 = vector.shape_cast %46 : vector<1x8x384xf32> to vector<8x384xf32>
    %48 = vector.extract_strided_slice %47 {offsets = [0, 0], sizes = [8, 128], strides = [1, 1]} : vector<8x384xf32> to vector<8x128xf32>
    %49 = vector.extract_strided_slice %45 {offsets = [0, 0], sizes = [8, 128], strides = [1, 1]} : vector<8x384xf32> to vector<8x128xf32>
    %50 = arith.addf %48, %49 : vector<8x128xf32>
    %51 = arith.negf %50 : vector<8x128xf32>
    %52 = math.exp %51 : vector<8x128xf32>
    %cst_22 = arith.constant 1.000000e+00 : f32
    %53 = vector.broadcast %cst_22 : f32 to vector<8x128xf32>
    %54 = arith.addf %53, %52 : vector<8x128xf32>
    %55 = arith.divf %53, %54 : vector<8x128xf32>
    %56 = vector.extract_strided_slice %47 {offsets = [0, 128], sizes = [8, 128], strides = [1, 1]} : vector<8x384xf32> to vector<8x128xf32>
    %57 = vector.extract_strided_slice %45 {offsets = [0, 128], sizes = [8, 128], strides = [1, 1]} : vector<8x384xf32> to vector<8x128xf32>
    %58 = arith.addf %56, %57 : vector<8x128xf32>
    %59 = arith.negf %58 : vector<8x128xf32>
    %60 = math.exp %59 : vector<8x128xf32>
    %cst_23 = arith.constant 1.000000e+00 : f32
    %61 = vector.broadcast %cst_23 : f32 to vector<8x128xf32>
    %62 = arith.addf %61, %60 : vector<8x128xf32>
    %63 = arith.divf %61, %62 : vector<8x128xf32>
    %64 = vector.extract_strided_slice %47 {offsets = [0, 256], sizes = [8, 128], strides = [1, 1]} : vector<8x384xf32> to vector<8x128xf32>
    %65 = vector.extract_strided_slice %45 {offsets = [0, 256], sizes = [8, 128], strides = [1, 1]} : vector<8x384xf32> to vector<8x128xf32>
    %66 = vector.broadcast %4 : vector<1x128xf32> to vector<8x128xf32>
    %67 = arith.addf %65, %66 : vector<8x128xf32>
    %68 = arith.mulf %55, %67 : vector<8x128xf32>
    %69 = arith.addf %64, %68 : vector<8x128xf32>
    %70 = math.tanh %69 : vector<8x128xf32>
    %cst_24 = arith.constant 1.000000e+00 : f32
    %71 = vector.broadcast %cst_24 : f32 to vector<8x128xf32>
    %72 = arith.subf %71, %63 : vector<8x128xf32>
    %73 = arith.mulf %72, %70 : vector<8x128xf32>
    %74 = arith.mulf %63, %43 : vector<8x128xf32>
    %75 = arith.addf %73, %74 : vector<8x128xf32>
    %c0_25 = arith.constant 0 : index
    %c0_26 = arith.constant 0 : index
    %76 = vector.load %arg7[%c0_25, %c0_26] : memref<8x128xf32, #tpu.memory_space<vmem>>, vector<8x128xf32>
    tpu.vector_store %arg7[%c0_25, %c0_26], %75 {strides = array<i32>} : memref<8x128xf32, #tpu.memory_space<vmem>>, vector<8x128xf32>,
    %77 = arith.truncf %75 : vector<8x128xf32> to vector<8x128xbf16>
    %c1_27 = arith.constant 1 : index
    %c0_28 = arith.constant 0 : index
    %c0_29 = arith.constant 0 : index
    %78 = vector.load %arg5[%c1_27, %c0_28, %c0_29] : memref<8x8x128xbf16, #tpu.memory_space<vmem>>, vector<1x8x128xbf16>
    %79 = vector.shape_cast %78 : vector<1x8x128xbf16> to vector<8x128xbf16>
    %80 = vector.shape_cast %77 : vector<8x128xbf16> to vector<1x8x128xbf16>
    tpu.vector_store %arg5[%c1_27, %c0_28, %c0_29], %80 {strides = array<i32>} : memref<8x8x128xbf16, #tpu.memory_space<vmem>>, vector<1x8x128xbf16>,
    %c0_30 = arith.constant 0 : index
    %c0_31 = arith.constant 0 : index
    %81 = vector.load %arg7[%c0_30, %c0_31] : memref<8x128xf32, #tpu.memory_space<vmem>>, vector<8x128xf32>
    %82 = arith.truncf %81 : vector<8x128xf32> to vector<8x128xbf16>
    %cst_32 = arith.constant dense<0.000000e+00> : vector<8x384xf32>
    %83 = tpu.matmul %82, %3, %cst_32 {dimension_numbers = #tpu.dot_dimension_numbers<[1], [0], [0], [1], [0, 0, 1, 1], [], []>} : vector<8x128xbf16>, vector<128x384xbf16>, vector<8x384xf32> -> vector<8x384xf32>
    %c2 = arith.constant 2 : index
    %c0_33 = arith.constant 0 : index
    %c0_34 = arith.constant 0 : index
    %84 = vector.load %arg2[%c2, %c0_33, %c0_34] : memref<8x8x384xf32, #tpu.memory_space<vmem>>, vector<1x8x384xf32>
    %85 = vector.shape_cast %84 : vector<1x8x384xf32> to vector<8x384xf32>
    %86 = vector.extract_strided_slice %85 {offsets = [0, 0], sizes = [8, 128], strides = [1, 1]} : vector<8x384xf32> to vector<8x128xf32>
    %87 = vector.extract_strided_slice %83 {offsets = [0, 0], sizes = [8, 128], strides = [1, 1]} : vector<8x384xf32> to vector<8x128xf32>
    %88 = arith.addf %86, %87 : vector<8x128xf32>
    %89 = arith.negf %88 : vector<8x128xf32>
    %90 = math.exp %89 : vector<8x128xf32>
    %cst_35 = arith.constant 1.000000e+00 : f32
    %91 = vector.broadcast %cst_35 : f32 to vector<8x128xf32>
    %92 = arith.addf %91, %90 : vector<8x128xf32>
    %93 = arith.divf %91, %92 : vector<8x128xf32>
    %94 = vector.extract_strided_slice %85 {offsets = [0, 128], sizes = [8, 128], strides = [1, 1]} : vector<8x384xf32> to vector<8x128xf32>
    %95 = vector.extract_strided_slice %83 {offsets = [0, 128], sizes = [8, 128], strides = [1, 1]} : vector<8x384xf32> to vector<8x128xf32>
    %96 = arith.addf %94, %95 : vector<8x128xf32>
    %97 = arith.negf %96 : vector<8x128xf32>
    %98 = math.exp %97 : vector<8x128xf32>
    %cst_36 = arith.constant 1.000000e+00 : f32
    %99 = vector.broadcast %cst_36 : f32 to vector<8x128xf32>
    %100 = arith.addf %99, %98 : vector<8x128xf32>
    %101 = arith.divf %99, %100 : vector<8x128xf32>
    %102 = vector.extract_strided_slice %85 {offsets = [0, 256], sizes = [8, 128], strides = [1, 1]} : vector<8x384xf32> to vector<8x128xf32>
    %103 = vector.extract_strided_slice %83 {offsets = [0, 256], sizes = [8, 128], strides = [1, 1]} : vector<8x384xf32> to vector<8x128xf32>
    %104 = vector.broadcast %4 : vector<1x128xf32> to vector<8x128xf32>
    %105 = arith.addf %103, %104 : vector<8x128xf32>
    %106 = arith.mulf %93, %105 : vector<8x128xf32>
    %107 = arith.addf %102, %106 : vector<8x128xf32>
    %108 = math.tanh %107 : vector<8x128xf32>
    %cst_37 = arith.constant 1.000000e+00 : f32
    %109 = vector.broadcast %cst_37 : f32 to vector<8x128xf32>
    %110 = arith.subf %109, %101 : vector<8x128xf32>
    %111 = arith.mulf %110, %108 : vector<8x128xf32>
    %112 = arith.mulf %101, %81 : vector<8x128xf32>
    %113 = arith.addf %111, %112 : vector<8x128xf32>
    %c0_38 = arith.constant 0 : index
    %c0_39 = arith.constant 0 : index
    %114 = vector.load %arg7[%c0_38, %c0_39] : memref<8x128xf32, #tpu.memory_space<vmem>>, vector<8x128xf32>
    tpu.vector_store %arg7[%c0_38, %c0_39], %113 {strides = array<i32>} : memref<8x128xf32, #tpu.memory_space<vmem>>, vector<8x128xf32>,
    %115 = arith.truncf %113 : vector<8x128xf32> to vector<8x128xbf16>
    %c2_40 = arith.constant 2 : index
    %c0_41 = arith.constant 0 : index
    %c0_42 = arith.constant 0 : index
    %116 = vector.load %arg5[%c2_40, %c0_41, %c0_42] : memref<8x8x128xbf16, #tpu.memory_space<vmem>>, vector<1x8x128xbf16>
    %117 = vector.shape_cast %116 : vector<1x8x128xbf16> to vector<8x128xbf16>
    %118 = vector.shape_cast %115 : vector<8x128xbf16> to vector<1x8x128xbf16>
    tpu.vector_store %arg5[%c2_40, %c0_41, %c0_42], %118 {strides = array<i32>} : memref<8x8x128xbf16, #tpu.memory_space<vmem>>, vector<1x8x128xbf16>,
    %c0_43 = arith.constant 0 : index
    %c0_44 = arith.constant 0 : index
    %119 = vector.load %arg7[%c0_43, %c0_44] : memref<8x128xf32, #tpu.memory_space<vmem>>, vector<8x128xf32>
    %120 = arith.truncf %119 : vector<8x128xf32> to vector<8x128xbf16>
    %cst_45 = arith.constant dense<0.000000e+00> : vector<8x384xf32>
    %121 = tpu.matmul %120, %3, %cst_45 {dimension_numbers = #tpu.dot_dimension_numbers<[1], [0], [0], [1], [0, 0, 1, 1], [], []>} : vector<8x128xbf16>, vector<128x384xbf16>, vector<8x384xf32> -> vector<8x384xf32>
    %c3 = arith.constant 3 : index
    %c0_46 = arith.constant 0 : index
    %c0_47 = arith.constant 0 : index
    %122 = vector.load %arg2[%c3, %c0_46, %c0_47] : memref<8x8x384xf32, #tpu.memory_space<vmem>>, vector<1x8x384xf32>
    %123 = vector.shape_cast %122 : vector<1x8x384xf32> to vector<8x384xf32>
    %124 = vector.extract_strided_slice %123 {offsets = [0, 0], sizes = [8, 128], strides = [1, 1]} : vector<8x384xf32> to vector<8x128xf32>
    %125 = vector.extract_strided_slice %121 {offsets = [0, 0], sizes = [8, 128], strides = [1, 1]} : vector<8x384xf32> to vector<8x128xf32>
    %126 = arith.addf %124, %125 : vector<8x128xf32>
    %127 = arith.negf %126 : vector<8x128xf32>
    %128 = math.exp %127 : vector<8x128xf32>
    %cst_48 = arith.constant 1.000000e+00 : f32
    %129 = vector.broadcast %cst_48 : f32 to vector<8x128xf32>
    %130 = arith.addf %129, %128 : vector<8x128xf32>
    %131 = arith.divf %129, %130 : vector<8x128xf32>
    %132 = vector.extract_strided_slice %123 {offsets = [0, 128], sizes = [8, 128], strides = [1, 1]} : vector<8x384xf32> to vector<8x128xf32>
    %133 = vector.extract_strided_slice %121 {offsets = [0, 128], sizes = [8, 128], strides = [1, 1]} : vector<8x384xf32> to vector<8x128xf32>
    %134 = arith.addf %132, %133 : vector<8x128xf32>
    %135 = arith.negf %134 : vector<8x128xf32>
    %136 = math.exp %135 : vector<8x128xf32>
    %cst_49 = arith.constant 1.000000e+00 : f32
    %137 = vector.broadcast %cst_49 : f32 to vector<8x128xf32>
    %138 = arith.addf %137, %136 : vector<8x128xf32>
    %139 = arith.divf %137, %138 : vector<8x128xf32>
    %140 = vector.extract_strided_slice %123 {offsets = [0, 256], sizes = [8, 128], strides = [1, 1]} : vector<8x384xf32> to vector<8x128xf32>
    %141 = vector.extract_strided_slice %121 {offsets = [0, 256], sizes = [8, 128], strides = [1, 1]} : vector<8x384xf32> to vector<8x128xf32>
    %142 = vector.broadcast %4 : vector<1x128xf32> to vector<8x128xf32>
    %143 = arith.addf %141, %142 : vector<8x128xf32>
    %144 = arith.mulf %131, %143 : vector<8x128xf32>
    %145 = arith.addf %140, %144 : vector<8x128xf32>
    %146 = math.tanh %145 : vector<8x128xf32>
    %cst_50 = arith.constant 1.000000e+00 : f32
    %147 = vector.broadcast %cst_50 : f32 to vector<8x128xf32>
    %148 = arith.subf %147, %139 : vector<8x128xf32>
    %149 = arith.mulf %148, %146 : vector<8x128xf32>
    %150 = arith.mulf %139, %119 : vector<8x128xf32>
    %151 = arith.addf %149, %150 : vector<8x128xf32>
    %c0_51 = arith.constant 0 : index
    %c0_52 = arith.constant 0 : index
    %152 = vector.load %arg7[%c0_51, %c0_52] : memref<8x128xf32, #tpu.memory_space<vmem>>, vector<8x128xf32>
    tpu.vector_store %arg7[%c0_51, %c0_52], %151 {strides = array<i32>} : memref<8x128xf32, #tpu.memory_space<vmem>>, vector<8x128xf32>,
    %153 = arith.truncf %151 : vector<8x128xf32> to vector<8x128xbf16>
    %c3_53 = arith.constant 3 : index
    %c0_54 = arith.constant 0 : index
    %c0_55 = arith.constant 0 : index
    %154 = vector.load %arg5[%c3_53, %c0_54, %c0_55] : memref<8x8x128xbf16, #tpu.memory_space<vmem>>, vector<1x8x128xbf16>
    %155 = vector.shape_cast %154 : vector<1x8x128xbf16> to vector<8x128xbf16>
    %156 = vector.shape_cast %153 : vector<8x128xbf16> to vector<1x8x128xbf16>
    tpu.vector_store %arg5[%c3_53, %c0_54, %c0_55], %156 {strides = array<i32>} : memref<8x8x128xbf16, #tpu.memory_space<vmem>>, vector<1x8x128xbf16>,
    %c0_56 = arith.constant 0 : index
    %c0_57 = arith.constant 0 : index
    %157 = vector.load %arg7[%c0_56, %c0_57] : memref<8x128xf32, #tpu.memory_space<vmem>>, vector<8x128xf32>
    %158 = arith.truncf %157 : vector<8x128xf32> to vector<8x128xbf16>
    %cst_58 = arith.constant dense<0.000000e+00> : vector<8x384xf32>
    %159 = tpu.matmul %158, %3, %cst_58 {dimension_numbers = #tpu.dot_dimension_numbers<[1], [0], [0], [1], [0, 0, 1, 1], [], []>} : vector<8x128xbf16>, vector<128x384xbf16>, vector<8x384xf32> -> vector<8x384xf32>
    %c4 = arith.constant 4 : index
    %c0_59 = arith.constant 0 : index
    %c0_60 = arith.constant 0 : index
    %160 = vector.load %arg2[%c4, %c0_59, %c0_60] : memref<8x8x384xf32, #tpu.memory_space<vmem>>, vector<1x8x384xf32>
    %161 = vector.shape_cast %160 : vector<1x8x384xf32> to vector<8x384xf32>
    %162 = vector.extract_strided_slice %161 {offsets = [0, 0], sizes = [8, 128], strides = [1, 1]} : vector<8x384xf32> to vector<8x128xf32>
    %163 = vector.extract_strided_slice %159 {offsets = [0, 0], sizes = [8, 128], strides = [1, 1]} : vector<8x384xf32> to vector<8x128xf32>
    %164 = arith.addf %162, %163 : vector<8x128xf32>
    %165 = arith.negf %164 : vector<8x128xf32>
    %166 = math.exp %165 : vector<8x128xf32>
    %cst_61 = arith.constant 1.000000e+00 : f32
    %167 = vector.broadcast %cst_61 : f32 to vector<8x128xf32>
    %168 = arith.addf %167, %166 : vector<8x128xf32>
    %169 = arith.divf %167, %168 : vector<8x128xf32>
    %170 = vector.extract_strided_slice %161 {offsets = [0, 128], sizes = [8, 128], strides = [1, 1]} : vector<8x384xf32> to vector<8x128xf32>
    %171 = vector.extract_strided_slice %159 {offsets = [0, 128], sizes = [8, 128], strides = [1, 1]} : vector<8x384xf32> to vector<8x128xf32>
    %172 = arith.addf %170, %171 : vector<8x128xf32>
    %173 = arith.negf %172 : vector<8x128xf32>
    %174 = math.exp %173 : vector<8x128xf32>
    %cst_62 = arith.constant 1.000000e+00 : f32
    %175 = vector.broadcast %cst_62 : f32 to vector<8x128xf32>
    %176 = arith.addf %175, %174 : vector<8x128xf32>
    %177 = arith.divf %175, %176 : vector<8x128xf32>
    %178 = vector.extract_strided_slice %161 {offsets = [0, 256], sizes = [8, 128], strides = [1, 1]} : vector<8x384xf32> to vector<8x128xf32>
    %179 = vector.extract_strided_slice %159 {offsets = [0, 256], sizes = [8, 128], strides = [1, 1]} : vector<8x384xf32> to vector<8x128xf32>
    %180 = vector.broadcast %4 : vector<1x128xf32> to vector<8x128xf32>
    %181 = arith.addf %179, %180 : vector<8x128xf32>
    %182 = arith.mulf %169, %181 : vector<8x128xf32>
    %183 = arith.addf %178, %182 : vector<8x128xf32>
    %184 = math.tanh %183 : vector<8x128xf32>
    %cst_63 = arith.constant 1.000000e+00 : f32
    %185 = vector.broadcast %cst_63 : f32 to vector<8x128xf32>
    %186 = arith.subf %185, %177 : vector<8x128xf32>
    %187 = arith.mulf %186, %184 : vector<8x128xf32>
    %188 = arith.mulf %177, %157 : vector<8x128xf32>
    %189 = arith.addf %187, %188 : vector<8x128xf32>
    %c0_64 = arith.constant 0 : index
    %c0_65 = arith.constant 0 : index
    %190 = vector.load %arg7[%c0_64, %c0_65] : memref<8x128xf32, #tpu.memory_space<vmem>>, vector<8x128xf32>
    tpu.vector_store %arg7[%c0_64, %c0_65], %189 {strides = array<i32>} : memref<8x128xf32, #tpu.memory_space<vmem>>, vector<8x128xf32>,
    %191 = arith.truncf %189 : vector<8x128xf32> to vector<8x128xbf16>
    %c4_66 = arith.constant 4 : index
    %c0_67 = arith.constant 0 : index
    %c0_68 = arith.constant 0 : index
    %192 = vector.load %arg5[%c4_66, %c0_67, %c0_68] : memref<8x8x128xbf16, #tpu.memory_space<vmem>>, vector<1x8x128xbf16>
    %193 = vector.shape_cast %192 : vector<1x8x128xbf16> to vector<8x128xbf16>
    %194 = vector.shape_cast %191 : vector<8x128xbf16> to vector<1x8x128xbf16>
    tpu.vector_store %arg5[%c4_66, %c0_67, %c0_68], %194 {strides = array<i32>} : memref<8x8x128xbf16, #tpu.memory_space<vmem>>, vector<1x8x128xbf16>,
    %c0_69 = arith.constant 0 : index
    %c0_70 = arith.constant 0 : index
    %195 = vector.load %arg7[%c0_69, %c0_70] : memref<8x128xf32, #tpu.memory_space<vmem>>, vector<8x128xf32>
    %196 = arith.truncf %195 : vector<8x128xf32> to vector<8x128xbf16>
    %cst_71 = arith.constant dense<0.000000e+00> : vector<8x384xf32>
    %197 = tpu.matmul %196, %3, %cst_71 {dimension_numbers = #tpu.dot_dimension_numbers<[1], [0], [0], [1], [0, 0, 1, 1], [], []>} : vector<8x128xbf16>, vector<128x384xbf16>, vector<8x384xf32> -> vector<8x384xf32>
    %c5 = arith.constant 5 : index
    %c0_72 = arith.constant 0 : index
    %c0_73 = arith.constant 0 : index
    %198 = vector.load %arg2[%c5, %c0_72, %c0_73] : memref<8x8x384xf32, #tpu.memory_space<vmem>>, vector<1x8x384xf32>
    %199 = vector.shape_cast %198 : vector<1x8x384xf32> to vector<8x384xf32>
    %200 = vector.extract_strided_slice %199 {offsets = [0, 0], sizes = [8, 128], strides = [1, 1]} : vector<8x384xf32> to vector<8x128xf32>
    %201 = vector.extract_strided_slice %197 {offsets = [0, 0], sizes = [8, 128], strides = [1, 1]} : vector<8x384xf32> to vector<8x128xf32>
    %202 = arith.addf %200, %201 : vector<8x128xf32>
    %203 = arith.negf %202 : vector<8x128xf32>
    %204 = math.exp %203 : vector<8x128xf32>
    %cst_74 = arith.constant 1.000000e+00 : f32
    %205 = vector.broadcast %cst_74 : f32 to vector<8x128xf32>
    %206 = arith.addf %205, %204 : vector<8x128xf32>
    %207 = arith.divf %205, %206 : vector<8x128xf32>
    %208 = vector.extract_strided_slice %199 {offsets = [0, 128], sizes = [8, 128], strides = [1, 1]} : vector<8x384xf32> to vector<8x128xf32>
    %209 = vector.extract_strided_slice %197 {offsets = [0, 128], sizes = [8, 128], strides = [1, 1]} : vector<8x384xf32> to vector<8x128xf32>
    %210 = arith.addf %208, %209 : vector<8x128xf32>
    %211 = arith.negf %210 : vector<8x128xf32>
    %212 = math.exp %211 : vector<8x128xf32>
    %cst_75 = arith.constant 1.000000e+00 : f32
    %213 = vector.broadcast %cst_75 : f32 to vector<8x128xf32>
    %214 = arith.addf %213, %212 : vector<8x128xf32>
    %215 = arith.divf %213, %214 : vector<8x128xf32>
    %216 = vector.extract_strided_slice %199 {offsets = [0, 256], sizes = [8, 128], strides = [1, 1]} : vector<8x384xf32> to vector<8x128xf32>
    %217 = vector.extract_strided_slice %197 {offsets = [0, 256], sizes = [8, 128], strides = [1, 1]} : vector<8x384xf32> to vector<8x128xf32>
    %218 = vector.broadcast %4 : vector<1x128xf32> to vector<8x128xf32>
    %219 = arith.addf %217, %218 : vector<8x128xf32>
    %220 = arith.mulf %207, %219 : vector<8x128xf32>
    %221 = arith.addf %216, %220 : vector<8x128xf32>
    %222 = math.tanh %221 : vector<8x128xf32>
    %cst_76 = arith.constant 1.000000e+00 : f32
    %223 = vector.broadcast %cst_76 : f32 to vector<8x128xf32>
    %224 = arith.subf %223, %215 : vector<8x128xf32>
    %225 = arith.mulf %224, %222 : vector<8x128xf32>
    %226 = arith.mulf %215, %195 : vector<8x128xf32>
    %227 = arith.addf %225, %226 : vector<8x128xf32>
    %c0_77 = arith.constant 0 : index
    %c0_78 = arith.constant 0 : index
    %228 = vector.load %arg7[%c0_77, %c0_78] : memref<8x128xf32, #tpu.memory_space<vmem>>, vector<8x128xf32>
    tpu.vector_store %arg7[%c0_77, %c0_78], %227 {strides = array<i32>} : memref<8x128xf32, #tpu.memory_space<vmem>>, vector<8x128xf32>,
    %229 = arith.truncf %227 : vector<8x128xf32> to vector<8x128xbf16>
    %c5_79 = arith.constant 5 : index
    %c0_80 = arith.constant 0 : index
    %c0_81 = arith.constant 0 : index
    %230 = vector.load %arg5[%c5_79, %c0_80, %c0_81] : memref<8x8x128xbf16, #tpu.memory_space<vmem>>, vector<1x8x128xbf16>
    %231 = vector.shape_cast %230 : vector<1x8x128xbf16> to vector<8x128xbf16>
    %232 = vector.shape_cast %229 : vector<8x128xbf16> to vector<1x8x128xbf16>
    tpu.vector_store %arg5[%c5_79, %c0_80, %c0_81], %232 {strides = array<i32>} : memref<8x8x128xbf16, #tpu.memory_space<vmem>>, vector<1x8x128xbf16>,
    %c0_82 = arith.constant 0 : index
    %c0_83 = arith.constant 0 : index
    %233 = vector.load %arg7[%c0_82, %c0_83] : memref<8x128xf32, #tpu.memory_space<vmem>>, vector<8x128xf32>
    %234 = arith.truncf %233 : vector<8x128xf32> to vector<8x128xbf16>
    %cst_84 = arith.constant dense<0.000000e+00> : vector<8x384xf32>
    %235 = tpu.matmul %234, %3, %cst_84 {dimension_numbers = #tpu.dot_dimension_numbers<[1], [0], [0], [1], [0, 0, 1, 1], [], []>} : vector<8x128xbf16>, vector<128x384xbf16>, vector<8x384xf32> -> vector<8x384xf32>
    %c6 = arith.constant 6 : index
    %c0_85 = arith.constant 0 : index
    %c0_86 = arith.constant 0 : index
    %236 = vector.load %arg2[%c6, %c0_85, %c0_86] : memref<8x8x384xf32, #tpu.memory_space<vmem>>, vector<1x8x384xf32>
    %237 = vector.shape_cast %236 : vector<1x8x384xf32> to vector<8x384xf32>
    %238 = vector.extract_strided_slice %237 {offsets = [0, 0], sizes = [8, 128], strides = [1, 1]} : vector<8x384xf32> to vector<8x128xf32>
    %239 = vector.extract_strided_slice %235 {offsets = [0, 0], sizes = [8, 128], strides = [1, 1]} : vector<8x384xf32> to vector<8x128xf32>
    %240 = arith.addf %238, %239 : vector<8x128xf32>
    %241 = arith.negf %240 : vector<8x128xf32>
    %242 = math.exp %241 : vector<8x128xf32>
    %cst_87 = arith.constant 1.000000e+00 : f32
    %243 = vector.broadcast %cst_87 : f32 to vector<8x128xf32>
    %244 = arith.addf %243, %242 : vector<8x128xf32>
    %245 = arith.divf %243, %244 : vector<8x128xf32>
    %246 = vector.extract_strided_slice %237 {offsets = [0, 128], sizes = [8, 128], strides = [1, 1]} : vector<8x384xf32> to vector<8x128xf32>
    %247 = vector.extract_strided_slice %235 {offsets = [0, 128], sizes = [8, 128], strides = [1, 1]} : vector<8x384xf32> to vector<8x128xf32>
    %248 = arith.addf %246, %247 : vector<8x128xf32>
    %249 = arith.negf %248 : vector<8x128xf32>
    %250 = math.exp %249 : vector<8x128xf32>
    %cst_88 = arith.constant 1.000000e+00 : f32
    %251 = vector.broadcast %cst_88 : f32 to vector<8x128xf32>
    %252 = arith.addf %251, %250 : vector<8x128xf32>
    %253 = arith.divf %251, %252 : vector<8x128xf32>
    %254 = vector.extract_strided_slice %237 {offsets = [0, 256], sizes = [8, 128], strides = [1, 1]} : vector<8x384xf32> to vector<8x128xf32>
    %255 = vector.extract_strided_slice %235 {offsets = [0, 256], sizes = [8, 128], strides = [1, 1]} : vector<8x384xf32> to vector<8x128xf32>
    %256 = vector.broadcast %4 : vector<1x128xf32> to vector<8x128xf32>
    %257 = arith.addf %255, %256 : vector<8x128xf32>
    %258 = arith.mulf %245, %257 : vector<8x128xf32>
    %259 = arith.addf %254, %258 : vector<8x128xf32>
    %260 = math.tanh %259 : vector<8x128xf32>
    %cst_89 = arith.constant 1.000000e+00 : f32
    %261 = vector.broadcast %cst_89 : f32 to vector<8x128xf32>
    %262 = arith.subf %261, %253 : vector<8x128xf32>
    %263 = arith.mulf %262, %260 : vector<8x128xf32>
    %264 = arith.mulf %253, %233 : vector<8x128xf32>
    %265 = arith.addf %263, %264 : vector<8x128xf32>
    %c0_90 = arith.constant 0 : index
    %c0_91 = arith.constant 0 : index
    %266 = vector.load %arg7[%c0_90, %c0_91] : memref<8x128xf32, #tpu.memory_space<vmem>>, vector<8x128xf32>
    tpu.vector_store %arg7[%c0_90, %c0_91], %265 {strides = array<i32>} : memref<8x128xf32, #tpu.memory_space<vmem>>, vector<8x128xf32>,
    %267 = arith.truncf %265 : vector<8x128xf32> to vector<8x128xbf16>
    %c6_92 = arith.constant 6 : index
    %c0_93 = arith.constant 0 : index
    %c0_94 = arith.constant 0 : index
    %268 = vector.load %arg5[%c6_92, %c0_93, %c0_94] : memref<8x8x128xbf16, #tpu.memory_space<vmem>>, vector<1x8x128xbf16>
    %269 = vector.shape_cast %268 : vector<1x8x128xbf16> to vector<8x128xbf16>
    %270 = vector.shape_cast %267 : vector<8x128xbf16> to vector<1x8x128xbf16>
    tpu.vector_store %arg5[%c6_92, %c0_93, %c0_94], %270 {strides = array<i32>} : memref<8x8x128xbf16, #tpu.memory_space<vmem>>, vector<1x8x128xbf16>,
    %c0_95 = arith.constant 0 : index
    %c0_96 = arith.constant 0 : index
    %271 = vector.load %arg7[%c0_95, %c0_96] : memref<8x128xf32, #tpu.memory_space<vmem>>, vector<8x128xf32>
    %272 = arith.truncf %271 : vector<8x128xf32> to vector<8x128xbf16>
    %cst_97 = arith.constant dense<0.000000e+00> : vector<8x384xf32>
    %273 = tpu.matmul %272, %3, %cst_97 {dimension_numbers = #tpu.dot_dimension_numbers<[1], [0], [0], [1], [0, 0, 1, 1], [], []>} : vector<8x128xbf16>, vector<128x384xbf16>, vector<8x384xf32> -> vector<8x384xf32>
    %c7 = arith.constant 7 : index
    %c0_98 = arith.constant 0 : index
    %c0_99 = arith.constant 0 : index
    %274 = vector.load %arg2[%c7, %c0_98, %c0_99] : memref<8x8x384xf32, #tpu.memory_space<vmem>>, vector<1x8x384xf32>
    %275 = vector.shape_cast %274 : vector<1x8x384xf32> to vector<8x384xf32>
    %276 = vector.extract_strided_slice %275 {offsets = [0, 0], sizes = [8, 128], strides = [1, 1]} : vector<8x384xf32> to vector<8x128xf32>
    %277 = vector.extract_strided_slice %273 {offsets = [0, 0], sizes = [8, 128], strides = [1, 1]} : vector<8x384xf32> to vector<8x128xf32>
    %278 = arith.addf %276, %277 : vector<8x128xf32>
    %279 = arith.negf %278 : vector<8x128xf32>
    %280 = math.exp %279 : vector<8x128xf32>
    %cst_100 = arith.constant 1.000000e+00 : f32
    %281 = vector.broadcast %cst_100 : f32 to vector<8x128xf32>
    %282 = arith.addf %281, %280 : vector<8x128xf32>
    %283 = arith.divf %281, %282 : vector<8x128xf32>
    %284 = vector.extract_strided_slice %275 {offsets = [0, 128], sizes = [8, 128], strides = [1, 1]} : vector<8x384xf32> to vector<8x128xf32>
    %285 = vector.extract_strided_slice %273 {offsets = [0, 128], sizes = [8, 128], strides = [1, 1]} : vector<8x384xf32> to vector<8x128xf32>
    %286 = arith.addf %284, %285 : vector<8x128xf32>
    %287 = arith.negf %286 : vector<8x128xf32>
    %288 = math.exp %287 : vector<8x128xf32>
    %cst_101 = arith.constant 1.000000e+00 : f32
    %289 = vector.broadcast %cst_101 : f32 to vector<8x128xf32>
    %290 = arith.addf %289, %288 : vector<8x128xf32>
    %291 = arith.divf %289, %290 : vector<8x128xf32>
    %292 = vector.extract_strided_slice %275 {offsets = [0, 256], sizes = [8, 128], strides = [1, 1]} : vector<8x384xf32> to vector<8x128xf32>
    %293 = vector.extract_strided_slice %273 {offsets = [0, 256], sizes = [8, 128], strides = [1, 1]} : vector<8x384xf32> to vector<8x128xf32>
    %294 = vector.broadcast %4 : vector<1x128xf32> to vector<8x128xf32>
    %295 = arith.addf %293, %294 : vector<8x128xf32>
    %296 = arith.mulf %283, %295 : vector<8x128xf32>
    %297 = arith.addf %292, %296 : vector<8x128xf32>
    %298 = math.tanh %297 : vector<8x128xf32>
    %cst_102 = arith.constant 1.000000e+00 : f32
    %299 = vector.broadcast %cst_102 : f32 to vector<8x128xf32>
    %300 = arith.subf %299, %291 : vector<8x128xf32>
    %301 = arith.mulf %300, %298 : vector<8x128xf32>
    %302 = arith.mulf %291, %271 : vector<8x128xf32>
    %303 = arith.addf %301, %302 : vector<8x128xf32>
    %c0_103 = arith.constant 0 : index
    %c0_104 = arith.constant 0 : index
    %304 = vector.load %arg7[%c0_103, %c0_104] : memref<8x128xf32, #tpu.memory_space<vmem>>, vector<8x128xf32>
    tpu.vector_store %arg7[%c0_103, %c0_104], %303 {strides = array<i32>} : memref<8x128xf32, #tpu.memory_space<vmem>>, vector<8x128xf32>,
    %305 = arith.truncf %303 : vector<8x128xf32> to vector<8x128xbf16>
    %c7_105 = arith.constant 7 : index
    %c0_106 = arith.constant 0 : index
    %c0_107 = arith.constant 0 : index
    %306 = vector.load %arg5[%c7_105, %c0_106, %c0_107] : memref<8x8x128xbf16, #tpu.memory_space<vmem>>, vector<1x8x128xbf16>
    %307 = vector.shape_cast %306 : vector<1x8x128xbf16> to vector<8x128xbf16>
    %308 = vector.shape_cast %305 : vector<8x128xbf16> to vector<1x8x128xbf16>
    tpu.vector_store %arg5[%c7_105, %c0_106, %c0_107], %308 {strides = array<i32>} : memref<8x8x128xbf16, #tpu.memory_space<vmem>>, vector<1x8x128xbf16>,
    %c0_i32_108 = arith.constant 0 : i32
    %309 = arith.cmpi eq, %arg0, %c0_i32_108 : i32
    %310 = arith.extui %309 : i1 to i32
    %c0_i32_109 = arith.constant 0 : i32
    %311 = arith.cmpi ne, %310, %c0_i32_109 : i32
    scf.if %311 {
      %c0_110 = arith.constant 0 : index
      %c0_111 = arith.constant 0 : index
      %312 = vector.load %arg7[%c0_110, %c0_111] : memref<8x128xf32, #tpu.memory_space<vmem>>, vector<8x128xf32>
      %c0_112 = arith.constant 0 : index
      %c0_113 = arith.constant 0 : index
      %313 = vector.load %arg6[%c0_112, %c0_113] : memref<8x128xf32, #tpu.memory_space<vmem>>, vector<8x128xf32>
      tpu.vector_store %arg6[%c0_112, %c0_113], %312 {strides = array<i32>} : memref<8x128xf32, #tpu.memory_space<vmem>>, vector<8x128xf32>,
    } else {
    }
    return
  }
  func.func @transform_0(%arg0: i32) -> (i32, i32) {
    %c0_i32 = arith.constant 0 : i32
    %c0_i32_0 = arith.constant 0 : i32
    %c0_i32_1 = arith.constant 0 : i32
    return %c0_i32, %c0_i32_0 : i32, i32
  }
  func.func @transform_1(%arg0: i32) -> (i32, i32, i32) {
    %c0_i32 = arith.constant 0 : i32
    %c0_i32_0 = arith.constant 0 : i32
    %c0_i32_1 = arith.constant 0 : i32
    return %arg0, %c0_i32, %c0_i32_0 : i32, i32, i32
  }
  func.func @transform_2(%arg0: i32) -> (i32, i32) {
    %c0_i32 = arith.constant 0 : i32
    %c0_i32_0 = arith.constant 0 : i32
    %c0_i32_1 = arith.constant 0 : i32
    return %c0_i32, %c0_i32_0 : i32, i32
  }
  func.func @transform_3(%arg0: i32) -> (i32, i32) {
    %c0_i32 = arith.constant 0 : i32
    %c0_i32_0 = arith.constant 0 : i32
    %c0_i32_1 = arith.constant 0 : i32
    return %c0_i32, %c0_i32_0 : i32, i32
  }
  func.func @transform_4(%arg0: i32) -> (i32, i32, i32) {
    %c0_i32 = arith.constant 0 : i32
    %c0_i32_0 = arith.constant 0 : i32
    %c0_i32_1 = arith.constant 0 : i32
    return %arg0, %c0_i32, %c0_i32_0 : i32, i32, i32
  }
  func.func @transform_5(%arg0: i32) -> (i32, i32) {
    %c0_i32 = arith.constant 0 : i32
    %c0_i32_0 = arith.constant 0 : i32
    %c0_i32_1 = arith.constant 0 : i32
    return %c0_i32, %c0_i32_0 : i32, i32
  }
}

</mosaic_0001>

<bundles_post_ra>
// kernel: decoder_forward.5
= control target key start
LH: loop header
LB: loop body
LE: loop exit
PB: predicated region body
PF: predicated region fallthrough
CT: control target
= control target key end

     0   :  { %8 = vsyncpa [#allocation3], 0  ;;  %s479_s0 = inlined_call_operand.vmem [shape: bf16[64,128], index: 0, kind: input, shape index: {}]   ;;  %s480_s1 = inlined_call_operand.hbm [shape: bf16[128,256], index: 1, kind: input, shape index: {}]   ;;  %s481_s2 = inlined_call_operand.vmem [shape: f32[1,256], index: 2, kind: input, shape index: {}]   ;;  %s482_s3 = inlined_call_operand.hbm [shape: f32[64,256], index: 3, kind: output, shape index: {}]  }
   0x1   :  { %9 = vsyncpa [#allocation4], 0  ;;  %s16_s14 = sshll.u32 %s480_s1, 4  ;;  %s432_s15 = smov [#allocation2]   ;;  %s17_s14 = int_to_ptr.hbm [resolvable:$true] %s16_s14 }
   0x2   :  { %s18_s16 = sshll.u32 %s432_s15, 4  ;;  %s433_s17 = smov 128   ;;  %s19_s16 = int_to_ptr.vmem [resolvable:$true] %s18_s16 }
   0x3   :  { %s434_s18 = smov 8  }
   0x4   :  { %24 = dma.hbm_to_vmem [thread:$0]  %s17_s14, 2048, %s19_s16, [#allocation3], %s433_s17, %s433_s17, %s434_s18  }
   0x5   :  { %428 = dma.done.wait [#allocation3], 2048  }
   0x6   :  { %429 = vsyncadd [#allocation3], 4294965248  ;;  %v332_v0 = vld [vmem:[#allocation2 + $0x70] sm:$0xf]  ;;  %v357_v1 = vld [vmem:[#allocation2 + $0x74] sm:$0xf0] }
   0x7   :  { %v356_v2 = vld [vmem:[#allocation2 + $0x74] sm:$0xf]  ;;  %v333_v3 = vor.u32 %v357_v1, %v332_v0  ;;  %v334_v4 = vld [vmem:[#allocation2 + $0x78] sm:$0xf0]  ;;  %v324_v5 = vld [vmem:[#allocation2 + $0x60] sm:$0xf] }
   0x8   :  { %v355_v6 = vld [vmem:[#allocation2 + $0x64] sm:$0xf0]  ;;  %v337_v7 = vor.u32 %v356_v2, %v334_v4  ;;  %v354_v8 = vld [vmem:[#allocation2 + $0x64] sm:$0xf]  ;;  %v326_v9 = vld [vmem:[#allocation2 + $0x68] sm:$0xf0] }
   0x9   :  { %165 = vmatpush.bf16.msra.mxu0 %v333_v3  ;;  %358 = vmatpush.bf16.msra.mxu2 %v333_v3  ;;  %v325_v10 = vor.u32 %v355_v6, %v324_v5  ;;  %v329_v11 = vor.u32 %v354_v8, %v326_v9  ;;  %v316_v12 = vld [vmem:[#allocation2 + $0x50] sm:$0xf]  ;;  %v353_v13 = vld [vmem:[#allocation2 + $0x54] sm:$0xf0]  ;;  %v352_v14 = vld [vmem:[#allocation2 + $0x54] sm:$0xf] }
   0xa   :  { %194 = vmatpush.bf16.msra.mxu1 %v337_v7  ;;  %366 = vmatpush.bf16.msra.mxu3 %v337_v7  ;;  %v318_v15 = vld [vmem:[#allocation2 + $0x58] sm:$0xf0]  ;;  %v317_v16 = vor.u32 %v353_v13, %v316_v12  ;;  %v308_v18 = vld [vmem:[#allocation2 + $0x40] sm:$0xf]  ;;  %v351_v19 = vld [vmem:[#allocation2 + $0x44] sm:$0xf0] }
   0xb   :  { %v321_v17 = vor.u32 %v352_v14, %v318_v15  ;;  %v350_v20 = vld [vmem:[#allocation2 + $0x44] sm:$0xf]  ;;  %v310_v21 = vld [vmem:[#allocation2 + $0x48] sm:$0xf0]  ;;  %v309_v22 = vor.u32 %v351_v19, %v308_v18  ;;  %v300_v24 = vld [vmem:[#allocation2 + $0x30] sm:$0xf] }
   0xc   :  { %v313_v23 = vor.u32 %v350_v20, %v310_v21  ;;  %v349_v25 = vld [vmem:[#allocation2 + $0x34] sm:$0xf0]  ;;  %v348_v26 = vld [vmem:[#allocation2 + $0x34] sm:$0xf]  ;;  %v302_v27 = vld [vmem:[#allocation2 + $0x38] sm:$0xf0] }
   0xd   :  { %166 = vmatpush.bf16.msra.mxu0 %v325_v10  ;;  %359 = vmatpush.bf16.msra.mxu2 %v325_v10  ;;  %v301_v28 = vor.u32 %v349_v25, %v300_v24  ;;  %v305_v29 = vor.u32 %v348_v26, %v302_v27  ;;  %v292_v30 = vld [vmem:[#allocation2 + $0x20] sm:$0xf]  ;;  %v347_v31 = vld [vmem:[#allocation2 + $0x24] sm:$0xf0]  ;;  %v346_v32 = vld [vmem:[#allocation2 + $0x24] sm:$0xf] }
   0xe   :  { %195 = vmatpush.bf16.msra.mxu1 %v329_v11  ;;  %367 = vmatpush.bf16.msra.mxu3 %v329_v11  ;;  %v294_v33 = vld [vmem:[#allocation2 + $0x28] sm:$0xf0]  ;;  %v293_v34 = vor.u32 %v347_v31, %v292_v30  ;;  %v284_v36 = vld [vmem:[#allocation2 + $0x10] sm:$0xf]  ;;  %v345_v37 = vld [vmem:[#allocation2 + $0x14] sm:$0xf0] }
   0xf   :  { %v297_v35 = vor.u32 %v346_v32, %v294_v33  ;;  %v344_v38 = vld [vmem:[#allocation2 + $0x14] sm:$0xf]  ;;  %v286_v39 = vld [vmem:[#allocation2 + $0x18] sm:$0xf0]  ;;  %v285_v40 = vor.u32 %v345_v37, %v284_v36  ;;  %v276_v42 = vld [vmem:[#allocation2] sm:$0xf] }
  0x10   :  { %v289_v41 = vor.u32 %v344_v38, %v286_v39  ;;  %v343_v43 = vld [vmem:[#allocation2 + $0x4] sm:$0xf0]  ;;  %v342_v44 = vld [vmem:[#allocation2 + $0x4] sm:$0xf]  ;;  %v278_v45 = vld [vmem:[#allocation2 + $0x8] sm:$0xf0] }
  0x11   :  { %167 = vmatpush.bf16.msra.mxu0 %v317_v16  ;;  %360 = vmatpush.bf16.msra.mxu2 %v317_v16  ;;  %v277_v46 = vor.u32 %v343_v43, %v276_v42  ;;  %v281_v47 = vor.u32 %v342_v44, %v278_v45  ;;  %v338_v48 = vld [vmem:[%s479_s0] sm:$0xff]  ;;  %v340_v49 = vld [vmem:[%s479_s0 + $0x10] sm:$0xff]  ;;  %v339_v50 = vld [vmem:[%s479_s0 + $0x8] sm:$0xff]  ;;  %s245_s30 = sshll.u32 %s482_s3, 4  ;;  %s436_s4 = smov 256   ;;  %s246_s30 = int_to_ptr.hbm [resolvable:$true] %s245_s30 }
  0x12   :  { %196 = vmatpush.bf16.msra.mxu1 %v321_v17  ;;  %368 = vmatpush.bf16.msra.mxu3 %v321_v17  ;;  %v341_v51 = vld [vmem:[%s479_s0 + $0x18] sm:$0xff]  ;;  %v55_v52 = vld [vmem:[%s481_s2] sm:$0x3]  ;;  %s435_s0 = smov [#allocation5]   ;;  %s437_s5 = smov 16  }
  0x13   :  { %v57_v53 = vperm.slane %v55_v52, 0  ;;  %v58_v54 = vperm.slane %v55_v52, 1  ;;  %s243_s2 = sshll.u32 %s435_s0, 4  ;;  %s244_s2 = int_to_ptr.vmem [resolvable:$true] %s243_s2 }
  0x15   :  { %168 = vmatpush.bf16.msra.mxu0 %v309_v22  ;;  %361 = vmatpush.bf16.msra.mxu2 %v309_v22 }
  0x16   :  { %197 = vmatpush.bf16.msra.mxu1 %v313_v23  ;;  %369 = vmatpush.bf16.msra.mxu3 %v313_v23 }
  0x19   :  { %169 = vmatpush.bf16.msra.mxu0 %v301_v28  ;;  %362 = vmatpush.bf16.msra.mxu2 %v301_v28 }
  0x1a   :  { %198 = vmatpush.bf16.msra.mxu1 %v305_v29  ;;  %370 = vmatpush.bf16.msra.mxu3 %v305_v29 }
  0x1d   :  { %170 = vmatpush.bf16.msra.mxu0 %v293_v34  ;;  %363 = vmatpush.bf16.msra.mxu2 %v293_v34 }
  0x1e   :  { %199 = vmatpush.bf16.msra.mxu1 %v297_v35  ;;  %371 = vmatpush.bf16.msra.mxu3 %v297_v35 }
  0x21   :  { %171 = vmatpush.bf16.msra.mxu0 %v285_v40  ;;  %364 = vmatpush.bf16.msra.mxu2 %v285_v40 }
  0x22   :  { %200 = vmatpush.bf16.msra.mxu1 %v289_v41  ;;  %372 = vmatpush.bf16.msra.mxu3 %v289_v41 }
  0x25   :  { %172 = vmatpush.bf16.msra.mxu0 %v277_v46  ;;  %365 = vmatpush.bf16.msra.mxu2 %v277_v46 }
  0x26   :  { %201 = vmatpush.bf16.msra.mxu1 %v281_v47  ;;  %373 = vmatpush.bf16.msra.mxu3 %v281_v47 }
  0x28   :  { %173 = vmatmul.bf16.vlgmr.msra.gmra.mxu0 %v338_v48  ;;  %183 = vmatmul.bf16.vlgmr.msra.gmra.mxu2 %v340_v49 }
  0x29   :  { %202 = vmatmul.bf16.vlgmr.msra.gmra.mxu1 %v338_v48  ;;  %212 = vmatmul.bf16.vlgmr.msra.gmra.mxu3 %v340_v49 }
  0x38   :  { %178 = vmatmul.bf16.gmra.mxu0 %v339_v50  ;;  %188 = vmatmul.bf16.gmra.mxu2 %v341_v51 }
  0x39   :  { %207 = vmatmul.bf16.gmra.mxu1 %v339_v50  ;;  %217 = vmatmul.bf16.gmra.mxu3 %v341_v51 }
  0xa5   :  { %v174_v55 = vpop.f32.mrf.mxu0 }
  0xa6   :  { %v175_v56 = vadd.f32 %v174_v55, %v57_v53  ;;  %v203_v57 = vpop.f32.mrf.mxu1 }
  0xa7   :  { %v204_v58 = vadd.f32 %v203_v57, %v58_v54 }
  0xa8   :  { %223 = vst [vmem:[#allocation5] sm:$0xff] %v175_v56 }
  0xa9   :  { %224 = vst [vmem:[#allocation5 + $0x8] sm:$0xff] %v204_v58 }
  0xab   :  { %v184_v59 = vpop.f32.mrf.mxu2 }
  0xac   :  { %v185_v60 = vadd.f32 %v184_v59, %v57_v53  ;;  %v213_v61 = vpop.f32.mrf.mxu3 }
  0xad   :  { %v214_v62 = vadd.f32 %v213_v61, %v58_v54  ;;  %v176_v63 = vpop.f32.mrf.mxu0 }
  0xae   :  { %231 = vst [vmem:[#allocation5 + $0x40] sm:$0xff] %v185_v60  ;;  %v177_v0 = vadd.f32 %v176_v63, %v57_v53  ;;  %v205_v1 = vpop.f32.mrf.mxu1 }
  0xaf   :  { %232 = vst [vmem:[#allocation5 + $0x48] sm:$0xff] %v214_v62  ;;  %v206_v2 = vadd.f32 %v205_v1, %v58_v54 }
  0xb0   :  { %225 = vst [vmem:[#allocation5 + $0x10] sm:$0xff] %v177_v0 }
  0xb1   :  { %226 = vst [vmem:[#allocation5 + $0x18] sm:$0xff] %v206_v2 }
  0xb3   :  { %v186_v3 = vpop.f32.mrf.mxu2 }
  0xb4   :  { %v187_v4 = vadd.f32 %v186_v3, %v57_v53  ;;  %v215_v5 = vpop.f32.mrf.mxu3 }
  0xb5   :  { %v216_v6 = vadd.f32 %v215_v5, %v58_v54  ;;  %v179_v7 = vpop.f32.mrf.mxu0 }
  0xb6   :  { %233 = vst [vmem:[#allocation5 + $0x50] sm:$0xff] %v187_v4  ;;  %v180_v8 = vadd.f32 %v179_v7, %v57_v53  ;;  %v208_v9 = vpop.f32.mrf.mxu1 }
  0xb7   :  { %234 = vst [vmem:[#allocation5 + $0x58] sm:$0xff] %v216_v6  ;;  %v209_v10 = vadd.f32 %v208_v9, %v58_v54 }
  0xb8   :  { %227 = vst [vmem:[#allocation5 + $0x20] sm:$0xff] %v180_v8 }
  0xb9   :  { %228 = vst [vmem:[#allocation5 + $0x28] sm:$0xff] %v209_v10 }
  0xbb   :  { %v189_v11 = vpop.f32.mrf.mxu2 }
  0xbc   :  { %v190_v12 = vadd.f32 %v189_v11, %v57_v53  ;;  %v218_v13 = vpop.f32.mrf.mxu3 }
  0xbd   :  { %v219_v14 = vadd.f32 %v218_v13, %v58_v54  ;;  %v181_v15 = vpop.f32.mrf.mxu0 }
  0xbe   :  { %235 = vst [vmem:[#allocation5 + $0x60] sm:$0xff] %v190_v12  ;;  %v182_v16 = vadd.f32 %v181_v15, %v57_v53  ;;  %v210_v17 = vpop.f32.mrf.mxu1 }
  0xbf   :  { %236 = vst [vmem:[#allocation5 + $0x68] sm:$0xff] %v219_v14  ;;  %v211_v18 = vadd.f32 %v210_v17, %v58_v54 }
  0xc0   :  { %229 = vst [vmem:[#allocation5 + $0x30] sm:$0xff] %v182_v16 }
  0xc1   :  { %230 = vst [vmem:[#allocation5 + $0x38] sm:$0xff] %v211_v18 }
  0xc3   :  { %v191_v19 = vpop.f32.mrf.mxu2 }
  0xc4   :  { %v192_v20 = vadd.f32 %v191_v19, %v57_v53  ;;  %v220_v21 = vpop.f32.mrf.mxu3 }
  0xc5   :  { %v221_v22 = vadd.f32 %v220_v21, %v58_v54 }
  0xc6   :  { %237 = vst [vmem:[#allocation5 + $0x70] sm:$0xff] %v192_v20 }
  0xc7   :  { %238 = vst [vmem:[#allocation5 + $0x78] sm:$0xff] %v221_v22 }
  0xc8   :  { %251 = dma.vmem_to_hbm [thread:$0]  %s244_s2, 2048, %s246_s30, [#allocation4], %s436_s4, %s436_s4, %s437_s5  }
  0xc9   :  { %430 = dma.done.wait [#allocation4], 2048  }
  0xca   :  { %431 = vsyncadd [#allocation4], 4294965248 }
  0xcb   :  { %256 = vsyncpa [#allocation3], 1 }
  0xcc   :  { %257 = vsyncpa [#allocation4], 1 }

// kernel: decoder_forward.3
= control target key start
LH: loop header
LB: loop body
LE: loop exit
PB: predicated region body
PF: predicated region fallthrough
CT: control target
= control target key end

     0   :  { %s748_s1 = inlined_call_operand.vmem [shape: bf16[128,384], index: 1, kind: input, shape index: {}]   ;;  %s749_s0 = inlined_call_operand.vmem [shape: bf16[64,128], index: 0, kind: input, shape index: {}]   ;;  %s750_s2 = inlined_call_operand.vmem [shape: f32[1,384], index: 2, kind: input, shape index: {}]   ;;  %s751_s3 = inlined_call_operand.vmem [shape: f32[64,384], index: 3, kind: output, shape index: {}]  }
   0x1   :  { %v466_v0 = vld [vmem:[%s748_s1 + $0xac] sm:$0xf]  ;;  %v433_v1 = vld [vmem:[%s748_s1 + $0xb4] sm:$0xf0]  ;;  %v439_v2 = vld [vmem:[%s748_s1 + $0xb0] sm:$0xf] }
   0x2   :  { %v436_v3 = vor.u32 %v466_v0, %v433_v1  ;;  %v468_v4 = vld [vmem:[%s748_s1 + $0xb8] sm:$0xf0]  ;;  %v463_v5 = vld [vmem:[%s748_s1 + $0x94] sm:$0xf]  ;;  %v421_v6 = vld [vmem:[%s748_s1 + $0x9c] sm:$0xf0] }
   0x3   :  { %v440_v7 = vor.u32 %v468_v4, %v439_v2  ;;  %v427_v8 = vld [vmem:[%s748_s1 + $0x98] sm:$0xf]  ;;  %v465_v9 = vld [vmem:[%s748_s1 + $0xa0] sm:$0xf0]  ;;  %v431_v10 = vld [vmem:[%s748_s1 + $0xa8] sm:$0xf]  ;;  %v424_v11 = vor.u32 %v463_v5, %v421_v6 }
   0x4   :  { %243 = vmatpush.bf16.msra.mxu1 %v436_v3  ;;  %v467_v12 = vld [vmem:[%s748_s1 + $0xb0] sm:$0xf0]  ;;  %v428_v13 = vor.u32 %v465_v9, %v427_v8  ;;  %v460_v15 = vld [vmem:[%s748_s1 + $0x7c] sm:$0xf]  ;;  %v409_v16 = vld [vmem:[%s748_s1 + $0x84] sm:$0xf0] }
   0x5   :  { %272 = vmatpush.bf16.msra.mxu2 %v440_v7  ;;  %v432_v14 = vor.u32 %v467_v12, %v431_v10  ;;  %v419_v17 = vld [vmem:[%s748_s1 + $0x90] sm:$0xf]  ;;  %v415_v18 = vld [vmem:[%s748_s1 + $0x80] sm:$0xf]  ;;  %v462_v19 = vld [vmem:[%s748_s1 + $0x88] sm:$0xf0]  ;;  %v412_v22 = vor.u32 %v460_v15, %v409_v16 }
   0x6   :  { %v464_v20 = vld [vmem:[%s748_s1 + $0x98] sm:$0xf0]  ;;  %v407_v23 = vld [vmem:[%s748_s1 + $0x78] sm:$0xf]  ;;  %v461_v24 = vld [vmem:[%s748_s1 + $0x80] sm:$0xf0]  ;;  %v416_v25 = vor.u32 %v462_v19, %v415_v18 }
   0x7   :  { %469 = vmatpush.bf16.msra.mxu3 %v432_v14  ;;  %v420_v21 = vor.u32 %v464_v20, %v419_v17  ;;  %214 = vmatpush.bf16.msra.mxu0 %v432_v14  ;;  %v457_v26 = vld [vmem:[%s748_s1 + $0x64] sm:$0xf]  ;;  %v397_v27 = vld [vmem:[%s748_s1 + $0x6c] sm:$0xf0]  ;;  %v403_v28 = vld [vmem:[%s748_s1 + $0x68] sm:$0xf]  ;;  %v408_v30 = vor.u32 %v461_v24, %v407_v23 }
   0x8   :  { %244 = vmatpush.bf16.msra.mxu1 %v424_v11  ;;  %v459_v29 = vld [vmem:[%s748_s1 + $0x70] sm:$0xf0]  ;;  %v400_v31 = vor.u32 %v457_v26, %v397_v27  ;;  %v395_v32 = vld [vmem:[%s748_s1 + $0x60] sm:$0xf]  ;;  %v458_v33 = vld [vmem:[%s748_s1 + $0x68] sm:$0xf0] }
   0x9   :  { %273 = vmatpush.bf16.msra.mxu2 %v428_v13  ;;  %v404_v34 = vor.u32 %v459_v29, %v403_v28  ;;  %v454_v35 = vld [vmem:[%s748_s1 + $0x4c] sm:$0xf]  ;;  %v385_v36 = vld [vmem:[%s748_s1 + $0x54] sm:$0xf0]  ;;  %v391_v37 = vld [vmem:[%s748_s1 + $0x50] sm:$0xf]  ;;  %v396_v39 = vor.u32 %v458_v33, %v395_v32 }
   0xa   :  { %v456_v38 = vld [vmem:[%s748_s1 + $0x58] sm:$0xf0]  ;;  %v388_v40 = vor.u32 %v454_v35, %v385_v36  ;;  %v383_v41 = vld [vmem:[%s748_s1 + $0x48] sm:$0xf]  ;;  %v455_v42 = vld [vmem:[%s748_s1 + $0x50] sm:$0xf0] }
   0xb   :  { %470 = vmatpush.bf16.msra.mxu3 %v420_v21  ;;  %215 = vmatpush.bf16.msra.mxu0 %v420_v21  ;;  %v392_v43 = vor.u32 %v456_v38, %v391_v37  ;;  %v451_v44 = vld [vmem:[%s748_s1 + $0x34] sm:$0xf]  ;;  %v373_v45 = vld [vmem:[%s748_s1 + $0x3c] sm:$0xf0]  ;;  %v379_v46 = vld [vmem:[%s748_s1 + $0x38] sm:$0xf]  ;;  %v384_v48 = vor.u32 %v455_v42, %v383_v41 }
   0xc   :  { %245 = vmatpush.bf16.msra.mxu1 %v412_v22  ;;  %v453_v47 = vld [vmem:[%s748_s1 + $0x40] sm:$0xf0]  ;;  %v376_v49 = vor.u32 %v451_v44, %v373_v45  ;;  %v371_v50 = vld [vmem:[%s748_s1 + $0x30] sm:$0xf]  ;;  %v452_v51 = vld [vmem:[%s748_s1 + $0x38] sm:$0xf0] }
   0xd   :  { %274 = vmatpush.bf16.msra.mxu2 %v416_v25  ;;  %v380_v52 = vor.u32 %v453_v47, %v379_v46  ;;  %v448_v53 = vld [vmem:[%s748_s1 + $0x1c] sm:$0xf]  ;;  %v361_v54 = vld [vmem:[%s748_s1 + $0x24] sm:$0xf0]  ;;  %v367_v55 = vld [vmem:[%s748_s1 + $0x20] sm:$0xf]  ;;  %v372_v57 = vor.u32 %v452_v51, %v371_v50 }
   0xe   :  { %v450_v56 = vld [vmem:[%s748_s1 + $0x28] sm:$0xf0]  ;;  %v364_v58 = vor.u32 %v448_v53, %v361_v54  ;;  %v359_v59 = vld [vmem:[%s748_s1 + $0x18] sm:$0xf]  ;;  %v449_v60 = vld [vmem:[%s748_s1 + $0x20] sm:$0xf0] }
   0xf   :  { %471 = vmatpush.bf16.msra.mxu3 %v408_v30  ;;  %216 = vmatpush.bf16.msra.mxu0 %v408_v30  ;;  %v368_v61 = vor.u32 %v450_v56, %v367_v55  ;;  %v445_v62 = vld [vmem:[%s748_s1 + $0x4] sm:$0xf]  ;;  %v349_v63 = vld [vmem:[%s748_s1 + $0xc] sm:$0xf0]  ;;  %v355_v0 = vld [vmem:[%s748_s1 + $0x8] sm:$0xf]  ;;  %v360_v2 = vor.u32 %v449_v60, %v359_v59 }
  0x10   :  { %246 = vmatpush.bf16.msra.mxu1 %v400_v31  ;;  %v447_v1 = vld [vmem:[%s748_s1 + $0x10] sm:$0xf0]  ;;  %v352_v3 = vor.u32 %v445_v62, %v349_v63  ;;  %v347_v4 = vld [vmem:[%s748_s1] sm:$0xf]  ;;  %v446_v5 = vld [vmem:[%s748_s1 + $0x8] sm:$0xf0] }
  0x11   :  { %275 = vmatpush.bf16.msra.mxu2 %v404_v34  ;;  %v356_v6 = vor.u32 %v447_v1, %v355_v0  ;;  %v441_v7 = vld [vmem:[%s749_s0] sm:$0xff]  ;;  %v348_v8 = vor.u32 %v446_v5, %v347_v4  ;;  %v442_v9 = vld [vmem:[%s749_s0 + $0x8] sm:$0xff]  ;;  %v443_v10 = vld [vmem:[%s749_s0 + $0x10] sm:$0xff] }
  0x12   :  { %v444_v11 = vld [vmem:[%s749_s0 + $0x18] sm:$0xff]  ;;  %v54_v12 = vld [vmem:[%s750_s2] sm:$0x7] }
  0x13   :  { %472 = vmatpush.bf16.msra.mxu3 %v396_v39  ;;  %217 = vmatpush.bf16.msra.mxu0 %v396_v39  ;;  %v656_v13 = vperm.slane %v54_v12, 1  ;;  %v662_v16 = vperm.slane %v54_v12, 2  ;;  %v56_v17 = vperm.slane %v54_v12, 0 }
  0x14   :  { %247 = vmatpush.bf16.msra.mxu1 %v388_v40 }
  0x15   :  { %276 = vmatpush.bf16.msra.mxu2 %v392_v43 }
  0x17   :  { %473 = vmatpush.bf16.msra.mxu3 %v384_v48  ;;  %218 = vmatpush.bf16.msra.mxu0 %v384_v48 }
  0x18   :  { %248 = vmatpush.bf16.msra.mxu1 %v376_v49 }
  0x19   :  { %277 = vmatpush.bf16.msra.mxu2 %v380_v52 }
  0x1b   :  { %474 = vmatpush.bf16.msra.mxu3 %v372_v57  ;;  %219 = vmatpush.bf16.msra.mxu0 %v372_v57 }
  0x1c   :  { %249 = vmatpush.bf16.msra.mxu1 %v364_v58 }
  0x1d   :  { %278 = vmatpush.bf16.msra.mxu2 %v368_v61 }
  0x1f   :  { %475 = vmatpush.bf16.msra.mxu3 %v360_v2  ;;  %220 = vmatpush.bf16.msra.mxu0 %v360_v2 }
  0x20   :  { %250 = vmatpush.bf16.msra.mxu1 %v352_v3 }
  0x21   :  { %279 = vmatpush.bf16.msra.mxu2 %v356_v6 }
  0x23   :  { %251 = vmatmul.bf16.vlgmr.msra.gmra.mxu1 %v441_v7  ;;  %476 = vmatpush.bf16.msra.mxu3 %v348_v8 }
  0x24   :  { %280 = vmatmul.bf16.vlgmr.msra.gmra.mxu2 %v441_v7  ;;  %221 = vmatpush.bf16.msra.mxu0 %v348_v8 }
  0x26   :  { %227 = vmatmul.bf16.vlgmr.msra.gmra.mxu3 %v442_v9 }
  0x27   :  { %222 = vmatmul.bf16.vlgmr.msra.gmra.mxu0 %v441_v7 }
  0x33   :  { %256 = vmatmul.bf16.gmra.mxu1 %v442_v9 }
  0x34   :  { %285 = vmatmul.bf16.gmra.mxu2 %v442_v9 }
  0x36   :  { %232 = vmatmul.bf16.gmra.mxu3 %v443_v10 }
  0x43   :  { %261 = vmatmul.bf16.gmra.mxu1 %v443_v10 }
  0x44   :  { %290 = vmatmul.bf16.gmra.mxu2 %v443_v10 }
  0x46   :  { %237 = vmatmul.bf16.gmra.mxu3 %v444_v11 }
  0x53   :  { %266 = vmatmul.bf16.gmra.mxu1 %v444_v11 }
  0x54   :  { %295 = vmatmul.bf16.gmra.mxu2 %v444_v11 }
  0xa0   :  { %v252_v14 = vpop.f32.mrf.mxu1 }
  0xa1   :  { %v253_v15 = vadd.f32 %v252_v14, %v656_v13 }
  0xa3   :  { %302 = vst [vmem:[%s751_s3 + $0x8] sm:$0xff] %v253_v15 }
  0xa4   :  { %v223_v24 = vpop.f32.mrf.mxu0 }
  0xa5   :  { %v224_v25 = vadd.f32 %v223_v24, %v56_v17 }
  0xa7   :  { %v281_v18 = vpop.f32.mrf.mxu2  ;;  %301 = vst [vmem:[%s751_s3] sm:$0xff] %v224_v25 }
  0xa8   :  { %v282_v19 = vadd.f32 %v281_v18, %v662_v16  ;;  %v254_v20 = vpop.f32.mrf.mxu1 }
  0xa9   :  { %v255_v21 = vadd.f32 %v254_v20, %v656_v13  ;;  %v228_v22 = vpop.f32.mrf.mxu3 }
  0xaa   :  { %303 = vst [vmem:[%s751_s3 + $0x10] sm:$0xff] %v282_v19  ;;  %v229_v23 = vadd.f32 %v228_v22, %v56_v17 }
  0xab   :  { %305 = vst [vmem:[%s751_s3 + $0x20] sm:$0xff] %v255_v21 }
  0xac   :  { %307 = vst [vmem:[%s751_s3 + $0x30] sm:$0xff] %v229_v23  ;;  %v225_v32 = vpop.f32.mrf.mxu0 }
  0xad   :  { %v226_v33 = vadd.f32 %v225_v32, %v56_v17 }
  0xaf   :  { %v283_v26 = vpop.f32.mrf.mxu2  ;;  %304 = vst [vmem:[%s751_s3 + $0x18] sm:$0xff] %v226_v33 }
  0xb0   :  { %v284_v27 = vadd.f32 %v283_v26, %v662_v16  ;;  %v257_v28 = vpop.f32.mrf.mxu1 }
  0xb1   :  { %v258_v29 = vadd.f32 %v257_v28, %v656_v13  ;;  %v230_v30 = vpop.f32.mrf.mxu3 }
  0xb2   :  { %306 = vst [vmem:[%s751_s3 + $0x28] sm:$0xff] %v284_v27  ;;  %v231_v31 = vadd.f32 %v230_v30, %v56_v17 }
  0xb3   :  { %308 = vst [vmem:[%s751_s3 + $0x38] sm:$0xff] %v258_v29 }
  0xb4   :  { %310 = vst [vmem:[%s751_s3 + $0x48] sm:$0xff] %v231_v31 }
  0xb7   :  { %v286_v34 = vpop.f32.mrf.mxu2 }
  0xb8   :  { %v287_v35 = vadd.f32 %v286_v34, %v662_v16  ;;  %v259_v36 = vpop.f32.mrf.mxu1 }
  0xb9   :  { %v260_v37 = vadd.f32 %v259_v36, %v656_v13  ;;  %v233_v38 = vpop.f32.mrf.mxu3 }
  0xba   :  { %309 = vst [vmem:[%s751_s3 + $0x40] sm:$0xff] %v287_v35  ;;  %v234_v39 = vadd.f32 %v233_v38, %v56_v17 }
  0xbb   :  { %311 = vst [vmem:[%s751_s3 + $0x50] sm:$0xff] %v260_v37 }
  0xbc   :  { %313 = vst [vmem:[%s751_s3 + $0x60] sm:$0xff] %v234_v39 }
  0xbf   :  { %v288_v40 = vpop.f32.mrf.mxu2 }
  0xc0   :  { %v289_v41 = vadd.f32 %v288_v40, %v662_v16  ;;  %v262_v42 = vpop.f32.mrf.mxu1 }
  0xc1   :  { %v263_v43 = vadd.f32 %v262_v42, %v656_v13  ;;  %v235_v44 = vpop.f32.mrf.mxu3 }
  0xc2   :  { %312 = vst [vmem:[%s751_s3 + $0x58] sm:$0xff] %v289_v41  ;;  %v236_v45 = vadd.f32 %v235_v44, %v56_v17 }
  0xc3   :  { %314 = vst [vmem:[%s751_s3 + $0x68] sm:$0xff] %v263_v43 }
  0xc4   :  { %316 = vst [vmem:[%s751_s3 + $0x78] sm:$0xff] %v236_v45 }
  0xc7   :  { %v291_v46 = vpop.f32.mrf.mxu2 }
  0xc8   :  { %v292_v47 = vadd.f32 %v291_v46, %v662_v16  ;;  %v264_v48 = vpop.f32.mrf.mxu1 }
  0xc9   :  { %v265_v49 = vadd.f32 %v264_v48, %v656_v13  ;;  %v238_v50 = vpop.f32.mrf.mxu3 }
  0xca   :  { %315 = vst [vmem:[%s751_s3 + $0x70] sm:$0xff] %v292_v47  ;;  %v239_v51 = vadd.f32 %v238_v50, %v56_v17 }
  0xcb   :  { %317 = vst [vmem:[%s751_s3 + $0x80] sm:$0xff] %v265_v49 }
  0xcc   :  { %319 = vst [vmem:[%s751_s3 + $0x90] sm:$0xff] %v239_v51 }
  0xcf   :  { %v293_v52 = vpop.f32.mrf.mxu2 }
  0xd0   :  { %v294_v53 = vadd.f32 %v293_v52, %v662_v16  ;;  %v267_v54 = vpop.f32.mrf.mxu1 }
  0xd1   :  { %v268_v55 = vadd.f32 %v267_v54, %v656_v13  ;;  %v240_v56 = vpop.f32.mrf.mxu3 }
  0xd2   :  { %318 = vst [vmem:[%s751_s3 + $0x88] sm:$0xff] %v294_v53  ;;  %v241_v57 = vadd.f32 %v240_v56, %v56_v17 }
  0xd3   :  { %320 = vst [vmem:[%s751_s3 + $0x98] sm:$0xff] %v268_v55 }
  0xd4   :  { %322 = vst [vmem:[%s751_s3 + $0xa8] sm:$0xff] %v241_v57 }
  0xd7   :  { %v296_v58 = vpop.f32.mrf.mxu2 }
  0xd8   :  { %v297_v59 = vadd.f32 %v296_v58, %v662_v16  ;;  %v269_v60 = vpop.f32.mrf.mxu1 }
  0xd9   :  { %v270_v61 = vadd.f32 %v269_v60, %v656_v13 }
  0xda   :  { %321 = vst [vmem:[%s751_s3 + $0xa0] sm:$0xff] %v297_v59 }
  0xdb   :  { %323 = vst [vmem:[%s751_s3 + $0xb0] sm:$0xff] %v270_v61 }
  0xdf   :  { %v298_v62 = vpop.f32.mrf.mxu2 }
  0xe0   :  { %v299_v63 = vadd.f32 %v298_v62, %v662_v16 }
  0xe2   :  { %324 = vst [vmem:[%s751_s3 + $0xb8] sm:$0xff] %v299_v63 }

// kernel: decoder_forward.4
= control target key start
LH: loop header
LB: loop body
LE: loop exit
PB: predicated region body
PF: predicated region fallthrough
CT: control target
= control target key end

     0   :  { %s1829_s0 = inlined_call_operand.vmem [shape: f32[8,128], index: 0, kind: input, shape index: {}]   ;;  %s1830_s1 = inlined_call_operand.vmem [shape: f32[8,8,384], index: 1, kind: input, shape index: {}]   ;;  %s1831_s2 = inlined_call_operand.vmem [shape: bf16[128,384], index: 2, kind: input, shape index: {}]   ;;  %s1832_s3 = inlined_call_operand.vmem [shape: f32[1,128], index: 3, kind: input, shape index: {}]   ;;  %s1833_s4 = inlined_call_operand.vmem [shape: bf16[8,8,128], index: 4, kind: output, shape index: {0}]   ;;  %s1834_s5 = inlined_call_operand.hbm [shape: f32[8,128], index: 5, kind: output, shape index: {1}]  }
   0x1   :  { %v1075_v0 = vld [vmem:[%s1831_s2 + $0xa8] sm:$0xf]  ;;  %v1151_v1 = vld [vmem:[%s1831_s2 + $0xb0] sm:$0xf0]  ;;  %v1150_v2 = vld [vmem:[%s1831_s2 + $0xac] sm:$0xf] }
   0x2   :  { %v1302_v3 = vor.u32 %v1151_v1, %v1075_v0  ;;  %v1077_v4 = vld [vmem:[%s1831_s2 + $0xb4] sm:$0xf0]  ;;  %v1063_v5 = vld [vmem:[%s1831_s2 + $0x90] sm:$0xf]  ;;  %v1148_v6 = vld [vmem:[%s1831_s2 + $0x98] sm:$0xf0] }
   0x3   :  { %v1313_v7 = vor.u32 %v1150_v2, %v1077_v4  ;;  %v1147_v8 = vld [vmem:[%s1831_s2 + $0x94] sm:$0xf]  ;;  %v1065_v9 = vld [vmem:[%s1831_s2 + $0x9c] sm:$0xf0]  ;;  %v1322_v10 = vor.u32 %v1148_v6, %v1063_v5  ;;  %v1051_v12 = vld [vmem:[%s1831_s2 + $0x78] sm:$0xf] }
   0x4   :  { %189 = vmatpush.bf16.msra.mxu0 %v1302_v3  ;;  %287 = vmatpush.bf16.msra.mxu3 %v1302_v3  ;;  %v1326_v11 = vor.u32 %v1147_v8, %v1065_v9  ;;  %v1145_v13 = vld [vmem:[%s1831_s2 + $0x80] sm:$0xf0]  ;;  %v1144_v14 = vld [vmem:[%s1831_s2 + $0x7c] sm:$0xf]  ;;  %v1053_v15 = vld [vmem:[%s1831_s2 + $0x84] sm:$0xf0] }
   0x5   :  { %202 = vmatpush.bf16.msra.mxu1 %v1313_v7  ;;  %v1083_v16 = vld [vmem:[%s1831_s2 + $0xb0] sm:$0xf]  ;;  %v1152_v17 = vld [vmem:[%s1831_s2 + $0xb8] sm:$0xf0]  ;;  %v1349_v19 = vor.u32 %v1145_v13, %v1051_v12  ;;  %v1071_v20 = vld [vmem:[%s1831_s2 + $0x98] sm:$0xf]  ;;  %v1359_v22 = vor.u32 %v1144_v14, %v1053_v15 }
   0x6   :  { %v1346_v18 = vor.u32 %v1152_v17, %v1083_v16  ;;  %v1149_v21 = vld [vmem:[%s1831_s2 + $0xa0] sm:$0xf0]  ;;  %v1039_v23 = vld [vmem:[%s1831_s2 + $0x60] sm:$0xf]  ;;  %v1142_v24 = vld [vmem:[%s1831_s2 + $0x68] sm:$0xf0] }
   0x7   :  { %v1141_v25 = vld [vmem:[%s1831_s2 + $0x64] sm:$0xf]  ;;  %v1371_v26 = vor.u32 %v1149_v21, %v1071_v20  ;;  %v1041_v27 = vld [vmem:[%s1831_s2 + $0x6c] sm:$0xf0]  ;;  %v1059_v28 = vld [vmem:[%s1831_s2 + $0x80] sm:$0xf]  ;;  %v1383_v30 = vor.u32 %v1142_v24, %v1039_v23 }
   0x8   :  { %190 = vmatpush.bf16.msra.mxu0 %v1322_v10  ;;  %288 = vmatpush.bf16.msra.mxu3 %v1322_v10  ;;  %v1146_v29 = vld [vmem:[%s1831_s2 + $0x88] sm:$0xf0]  ;;  %v1387_v31 = vor.u32 %v1141_v25, %v1041_v27  ;;  %v1027_v32 = vld [vmem:[%s1831_s2 + $0x48] sm:$0xf]  ;;  %v1139_v33 = vld [vmem:[%s1831_s2 + $0x50] sm:$0xf0] }
   0x9   :  { %203 = vmatpush.bf16.msra.mxu1 %v1326_v11  ;;  %215 = vmatpush.bf16.msra.mxu2 %v1346_v18  ;;  %v1138_v34 = vld [vmem:[%s1831_s2 + $0x4c] sm:$0xf]  ;;  %v1399_v35 = vor.u32 %v1146_v29, %v1059_v28  ;;  %v1029_v36 = vld [vmem:[%s1831_s2 + $0x54] sm:$0xf0]  ;;  %v1047_v37 = vld [vmem:[%s1831_s2 + $0x68] sm:$0xf]  ;;  %v1411_v39 = vor.u32 %v1139_v33, %v1027_v32 }
   0xa   :  { %v1143_v38 = vld [vmem:[%s1831_s2 + $0x70] sm:$0xf0]  ;;  %v1015_v40 = vld [vmem:[%s1831_s2 + $0x30] sm:$0xf]  ;;  %v1136_v41 = vld [vmem:[%s1831_s2 + $0x38] sm:$0xf0]  ;;  %v1421_v42 = vor.u32 %v1138_v34, %v1029_v36 }
   0xb   :  { %v1135_v43 = vld [vmem:[%s1831_s2 + $0x34] sm:$0xf]  ;;  %v1427_v44 = vor.u32 %v1143_v38, %v1047_v37 }
   0xc   :  { %191 = vmatpush.bf16.msra.mxu0 %v1349_v19  ;;  %289 = vmatpush.bf16.msra.mxu3 %v1349_v19 }
   0xd   :  { %204 = vmatpush.bf16.msra.mxu1 %v1359_v22  ;;  %216 = vmatpush.bf16.msra.mxu2 %v1371_v26 }
  0x10   :  { %192 = vmatpush.bf16.msra.mxu0 %v1383_v30  ;;  %290 = vmatpush.bf16.msra.mxu3 %v1383_v30 }
  0x11   :  { %205 = vmatpush.bf16.msra.mxu1 %v1387_v31  ;;  %217 = vmatpush.bf16.msra.mxu2 %v1399_v35 }
  0x12   :  { %11 = vsyncpa [#allocation4], 0  ;;  %v1017_v45 = vld [vmem:[%s1831_s2 + $0x3c] sm:$0xf0]  ;;  %v1035_v46 = vld [vmem:[%s1831_s2 + $0x50] sm:$0xf]  ;;  %v1439_v48 = vor.u32 %v1136_v41, %v1015_v40 }
  0x13   :  { %v1140_v47 = vld [vmem:[%s1831_s2 + $0x58] sm:$0xf0]  ;;  %v1443_v49 = vor.u32 %v1135_v43, %v1017_v45  ;;  %v1003_v50 = vld [vmem:[%s1831_s2 + $0x18] sm:$0xf]  ;;  %v1133_v51 = vld [vmem:[%s1831_s2 + $0x20] sm:$0xf0] }
  0x14   :  { %193 = vmatpush.bf16.msra.mxu0 %v1411_v39  ;;  %291 = vmatpush.bf16.msra.mxu3 %v1411_v39  ;;  %v1132_v52 = vld [vmem:[%s1831_s2 + $0x1c] sm:$0xf]  ;;  %v1455_v53 = vor.u32 %v1140_v47, %v1035_v46  ;;  %v1005_v54 = vld [vmem:[%s1831_s2 + $0x24] sm:$0xf0]  ;;  %v1023_v55 = vld [vmem:[%s1831_s2 + $0x38] sm:$0xf]  ;;  %v1467_v57 = vor.u32 %v1133_v51, %v1003_v50 }
  0x15   :  { %206 = vmatpush.bf16.msra.mxu1 %v1421_v42  ;;  %218 = vmatpush.bf16.msra.mxu2 %v1427_v44  ;;  %v1137_v56 = vld [vmem:[%s1831_s2 + $0x40] sm:$0xf0]  ;;  %v1471_v58 = vor.u32 %v1132_v52, %v1005_v54  ;;  %v991_v59 = vld [vmem:[%s1831_s2] sm:$0xf]  ;;  %v1130_v60 = vld [vmem:[%s1831_s2 + $0x8] sm:$0xf0] }
  0x16   :  { %v1129_v61 = vld [vmem:[%s1831_s2 + $0x4] sm:$0xf]  ;;  %v1483_v62 = vor.u32 %v1137_v56, %v1023_v55  ;;  %v993_v63 = vld [vmem:[%s1831_s2 + $0xc] sm:$0xf0]  ;;  %v1011_v0 = vld [vmem:[%s1831_s2 + $0x20] sm:$0xf]  ;;  %v1495_v2 = vor.u32 %v1130_v60, %v991_v59 }
  0x17   :  { %v1134_v1 = vld [vmem:[%s1831_s2 + $0x28] sm:$0xf0]  ;;  %v1500_v4 = vld [vmem:[%s1829_s0] sm:$0xff]  ;;  %v1504_v5 = vor.u32 %v1129_v61, %v993_v63  ;;  %v999_v8 = vld [vmem:[%s1831_s2 + $0x8] sm:$0xf]  ;;  %s978_s28 = sshll.u32 %s1834_s5, 4  ;;  %s979_s28 = int_to_ptr.hbm [resolvable:$true] %s978_s28 }
  0x18   :  { %194 = vmatpush.bf16.msra.mxu0 %v1439_v48  ;;  %292 = vmatpush.bf16.msra.mxu3 %v1439_v48  ;;  %v1507_v6 = vor.u32 %v1134_v1, %v1011_v0  ;;  %v1131_v9 = vld [vmem:[%s1831_s2 + $0x10] sm:$0xf0]  ;;  %v60_v12 = vpack.c.bf16 %v1500_v4, %v1500_v4  ;;  %v228_v14 = vld [vmem:[%s1830_s1] sm:$0xff]  ;;  %v229_v15 = vld [vmem:[%s1830_s1 + $0x8] sm:$0xff] }
  0x19   :  { %207 = vmatpush.bf16.msra.mxu1 %v1443_v49  ;;  %219 = vmatpush.bf16.msra.mxu2 %v1455_v53  ;;  %v1521_v13 = vor.u32 %v1131_v9, %v999_v8  ;;  %v1589_v45 = vld [vmem:[%s1832_s3] ss:$0 sm:$0xff]  ;;  %v230_v60 = vld [vmem:[%s1830_s1 + $0x10] sm:$0xff] }
  0x1c   :  { %195 = vmatpush.bf16.msra.mxu0 %v1467_v57  ;;  %293 = vmatpush.bf16.msra.mxu3 %v1467_v57 }
  0x1d   :  { %208 = vmatpush.bf16.msra.mxu1 %v1471_v58  ;;  %220 = vmatpush.bf16.msra.mxu2 %v1483_v62 }
  0x20   :  { %196 = vmatpush.bf16.msra.mxu0 %v1495_v2  ;;  %294 = vmatpush.bf16.msra.mxu3 %v1495_v2 }
  0x21   :  { %209 = vmatpush.bf16.msra.mxu1 %v1504_v5  ;;  %221 = vmatpush.bf16.msra.mxu2 %v1507_v6 }
  0x23   :  { %197 = vmatmul.bf16.vlgmr.msra.gmra.mxu0 %v60_v12 }
  0x24   :  { %300 = vmatpush.bf16.msrb.mxu0 %v1313_v7  ;;  %397 = vmatpush.bf16.msrb.mxu3 %v1313_v7 }
  0x25   :  { %313 = vmatpush.bf16.msrb.mxu1 %v1346_v18  ;;  %222 = vmatpush.bf16.msra.mxu2 %v1521_v13 }
  0x26   :  { %210 = vmatmul.bf16.vlgmr.msra.gmra.mxu1 %v60_v12 }
  0x28   :  { %301 = vmatpush.bf16.msrb.mxu0 %v1326_v11  ;;  %398 = vmatpush.bf16.msrb.mxu3 %v1326_v11 }
  0x29   :  { %314 = vmatpush.bf16.msrb.mxu1 %v1371_v26  ;;  %384 = vmatpush.bf16.msrb.mxu2 %v1302_v3 }
  0x2a   :  { %223 = vmatmul.bf16.vlgmr.msra.gmra.mxu2 %v60_v12 }
  0x2c   :  { %302 = vmatpush.bf16.msrb.mxu0 %v1359_v22  ;;  %399 = vmatpush.bf16.msrb.mxu3 %v1359_v22 }
  0x2d   :  { %315 = vmatpush.bf16.msrb.mxu1 %v1399_v35  ;;  %385 = vmatpush.bf16.msrb.mxu2 %v1322_v10 }
  0x30   :  { %303 = vmatpush.bf16.msrb.mxu0 %v1387_v31  ;;  %400 = vmatpush.bf16.msrb.mxu3 %v1387_v31 }
  0x31   :  { %316 = vmatpush.bf16.msrb.mxu1 %v1427_v44  ;;  %386 = vmatpush.bf16.msrb.mxu2 %v1349_v19 }
  0x34   :  { %304 = vmatpush.bf16.msrb.mxu0 %v1421_v42  ;;  %401 = vmatpush.bf16.msrb.mxu3 %v1421_v42 }
  0x35   :  { %317 = vmatpush.bf16.msrb.mxu1 %v1455_v53  ;;  %387 = vmatpush.bf16.msrb.mxu2 %v1383_v30 }
  0x38   :  { %305 = vmatpush.bf16.msrb.mxu0 %v1443_v49  ;;  %402 = vmatpush.bf16.msrb.mxu3 %v1443_v49 }
  0x39   :  { %318 = vmatpush.bf16.msrb.mxu1 %v1483_v62  ;;  %388 = vmatpush.bf16.msrb.mxu2 %v1411_v39 }
  0x3c   :  { %306 = vmatpush.bf16.msrb.mxu0 %v1471_v58  ;;  %403 = vmatpush.bf16.msrb.mxu3 %v1471_v58 }
  0x3d   :  { %319 = vmatpush.bf16.msrb.mxu1 %v1507_v6  ;;  %389 = vmatpush.bf16.msrb.mxu2 %v1439_v48 }
  0x40   :  { %307 = vmatpush.bf16.msrb.mxu0 %v1504_v5  ;;  %404 = vmatpush.bf16.msrb.mxu3 %v1504_v5 }
  0x41   :  { %320 = vmatpush.bf16.msrb.mxu1 %v1521_v13  ;;  %390 = vmatpush.bf16.msrb.mxu2 %v1467_v57 }
  0x44   :  { %410 = vmatpush.bf16.msra.mxu0 %v1346_v18 }
  0x45   :  { %481 = vmatpush.bf16.msra.mxu1 %v1302_v3  ;;  %391 = vmatpush.bf16.msrb.mxu2 %v1495_v2 }
  0x48   :  { %411 = vmatpush.bf16.msra.mxu0 %v1371_v26 }
  0x49   :  { %494 = vmatpush.bf16.msra.mxu2 %v1313_v7  ;;  %482 = vmatpush.bf16.msra.mxu1 %v1322_v10 }
  0x4c   :  { %412 = vmatpush.bf16.msra.mxu0 %v1399_v35 }
  0x4d   :  { %495 = vmatpush.bf16.msra.mxu2 %v1326_v11  ;;  %483 = vmatpush.bf16.msra.mxu1 %v1349_v19 }
  0x50   :  { %413 = vmatpush.bf16.msra.mxu0 %v1427_v44 }
  0x51   :  { %496 = vmatpush.bf16.msra.mxu2 %v1359_v22  ;;  %484 = vmatpush.bf16.msra.mxu1 %v1383_v30 }
  0x54   :  { %414 = vmatpush.bf16.msra.mxu0 %v1455_v53 }
  0x55   :  { %497 = vmatpush.bf16.msra.mxu2 %v1387_v31  ;;  %485 = vmatpush.bf16.msra.mxu1 %v1411_v39 }
  0x58   :  { %415 = vmatpush.bf16.msra.mxu0 %v1483_v62 }
  0x59   :  { %498 = vmatpush.bf16.msra.mxu2 %v1421_v42  ;;  %486 = vmatpush.bf16.msra.mxu1 %v1439_v48 }
  0x5c   :  { %416 = vmatpush.bf16.msra.mxu0 %v1507_v6 }
  0x5d   :  { %499 = vmatpush.bf16.msra.mxu2 %v1443_v49  ;;  %487 = vmatpush.bf16.msra.mxu1 %v1467_v57 }
  0x60   :  { %417 = vmatpush.bf16.msra.mxu0 %v1521_v13 }
  0x61   :  { %500 = vmatpush.bf16.msra.mxu2 %v1471_v58  ;;  %488 = vmatpush.bf16.msra.mxu1 %v1495_v2 }
  0x65   :  { %501 = vmatpush.bf16.msra.mxu2 %v1504_v5 }
  0xa0   :  { %v198_v16 = vpop.f32.mrf.mxu0 }
  0xa1   :  { %v231_v17 = vadd.f32 %v228_v14, %v198_v16 }
  0xa3   :  { %v211_v20 = vpop.f32.mrf.mxu1  ;;  %v1085_v23 = vmul.f32 -1.442695, %v231_v17 }
  0xa4   :  { %v251_v21 = vadd.f32 %v229_v15, %v211_v20 }
  0xa5   :  { %1155 = vpow2.f32 %v1085_v23 }
  0xa6   :  { %v1086_v24 = vmul.f32 -1.442695, %v251_v21 }
  0xa8   :  { %1157 = vpow2.f32 %v1086_v24  ;;  %v200_v25 = vpop.f32.mrf.mxu0 }
  0xab   :  { %v213_v27 = vpop.f32.mrf.mxu1  ;;  %v1156_v28 = vpop.eup %1155 }
  0xac   :  { %v235_v33 = vadd.f32 1.0, %v1156_v28 }
  0xad   :  { %v224_v29 = vpop.f32.mrf.mxu2 }
  0xae   :  { %v1158_v32 = vpop.eup %1157  ;;  %1159 = vrcp.f32 %v235_v33  ;;  %v247_v47 = vand.u32 2147483648, %v235_v33  ;;  %v245_v51 = vand.u32 2147483647, %v235_v33  ;;  %vm241_vm1 = vweird.f32 %v235_v33 }
  0xaf   :  { %v255_v34 = vadd.f32 1.0, %v1158_v32  ;;  %v274_v55 = vadd.f32 %v1589_v45, %v224_v29  ;;  %v1087_v32 = vld [vmem:[%s1830_s1 + $0x18] sm:$0xff] }
  0xb0   :  { %v248_v56 = vor.u32 1.1754944e-38, %v247_v47  ;;  %vm246_vm3 = vcmp.eq.f32.partialorder %v245_v51, 8.507059e+37 }
  0xb1   :  { %1161 = vrcp.f32 %v255_v34  ;;  %vm261_vm4 = vweird.f32 %v255_v34  ;;  %v267_v0 = vand.u32 2147483648, %v255_v34  ;;  %v265_v8 = vand.u32 2147483647, %v255_v34 }
  0xb3   :  { %v268_v14 = vor.u32 1.1754944e-38, %v267_v0  ;;  %vm266_vm7 = vcmp.eq.f32.partialorder %v265_v8, 8.507059e+37 }
  0xb4   :  { %v1160_v37 = vpop.eup %1159 }
  0xb5   :  { %v226_v36 = vpop.f32.mrf.mxu2  ;;  %v237_v40 = vmul.f32 %v1160_v37, %v235_v33  ;;  %vm242_vm0 = vweird.f32 %v1160_v37 }
  0xb6   :  { %vm243_vm2 = vmor %vm241_vm1, %vm242_vm0 }
  0xb7   :  { %v1162_v38 = vpop.eup %1161  ;;  %v238_v43 = vsub.f32 1.0, %v237_v40 }
  0xb8   :  { %v257_v41 = vmul.f32 %v1162_v38, %v255_v34  ;;  %vm262_vm5 = vweird.f32 %v1162_v38 }
  0xb9   :  { %v239_v50 = vmul.f32 %v1160_v37, %v238_v43  ;;  %vm263_vm6 = vmor %vm261_vm4, %vm262_vm5 }
  0xba   :  { %v258_v46 = vsub.f32 1.0, %v257_v41 }
  0xbb   :  { %v240_v54 = vadd.f32 %v1160_v37, %v239_v50 }
  0xbc   :  { %v259_v52 = vmul.f32 %v1162_v38, %v258_v46 }
  0xbd   :  { %v244_v59 = vsel %vm243_vm2, %v1160_v37, %v240_v54 }
  0xbe   :  { %v249_v61 = vsel %vm246_vm3, %v248_v56, %v244_v59  ;;  %v260_v63 = vadd.f32 %v1162_v38, %v259_v52 }
  0xbf   :  { %v275_v1 = vmul.f32 %v274_v55, %v249_v61 }
  0xc0   :  { %v264_v12 = vsel %vm263_vm6, %v1162_v38, %v260_v63 }
  0xc1   :  { %v276_v9 = vadd.f32 %v275_v1, %v230_v60  ;;  %v269_v15 = vsel %vm266_vm7, %v268_v14, %v264_v12  ;;  %v1089_v14 = vld [vmem:[%s1830_s1 + $0x28] sm:$0xff] }
  0xc2   :  { %v278_v16 = vsub.f32 1.0, %v269_v15  ;;  %v280_v21 = vmul.f32 %v269_v15, %v1500_v4  ;;  %v1088_v4 = vld [vmem:[%s1830_s1 + $0x20] sm:$0xff] }
  0xc3   :  { %1163 = vtanh.f32 %v276_v9 }
  0xc9   :  { %v1164_v17 = vpop.eup %1163 }
  0xca   :  { %v279_v20 = vmul.f32 %v1164_v17, %v278_v16 }
  0xcc   :  { %v1596_v23 = vadd.f32 %v280_v21, %v279_v20 }
  0xce   :  { %v283_v24 = vpack.c.bf16 %v1596_v23, %v1596_v23 }
  0xd0   :  { %284 = vst [vmem:[%s1833_s4] sm:$0xf] %v283_v24  ;;  %295 = vmatmul.bf16.vlgmr.msra.gmra.mxu3 %v283_v24  ;;  %308 = vmatmul.bf16.vlgmr.msrb.gmra.mxu0 %v283_v24 }
  0xd1   :  { %321 = vmatmul.bf16.vlgmr.msrb.gmra.mxu1 %v283_v24  ;;  %507 = vmatpush.bf16.msra.mxu3 %v1346_v18 }
  0xd2   :  { %578 = vmatpush.bf16.msrb.mxu0 %v1302_v3  ;;  %591 = vmatpush.bf16.msrb.mxu1 %v1313_v7 }
  0xd5   :  { %508 = vmatpush.bf16.msra.mxu3 %v1371_v26 }
  0xd6   :  { %579 = vmatpush.bf16.msrb.mxu0 %v1322_v10  ;;  %592 = vmatpush.bf16.msrb.mxu1 %v1326_v11 }
  0xd9   :  { %509 = vmatpush.bf16.msra.mxu3 %v1399_v35 }
  0xda   :  { %580 = vmatpush.bf16.msrb.mxu0 %v1349_v19  ;;  %593 = vmatpush.bf16.msrb.mxu1 %v1359_v22 }
  0xdd   :  { %510 = vmatpush.bf16.msra.mxu3 %v1427_v44 }
  0xde   :  { %581 = vmatpush.bf16.msrb.mxu0 %v1383_v30  ;;  %594 = vmatpush.bf16.msrb.mxu1 %v1387_v31 }
  0xe1   :  { %511 = vmatpush.bf16.msra.mxu3 %v1455_v53 }
  0xe2   :  { %582 = vmatpush.bf16.msrb.mxu0 %v1411_v39  ;;  %595 = vmatpush.bf16.msrb.mxu1 %v1421_v42 }
  0xe5   :  { %512 = vmatpush.bf16.msra.mxu3 %v1483_v62 }
  0xe6   :  { %583 = vmatpush.bf16.msrb.mxu0 %v1439_v48  ;;  %596 = vmatpush.bf16.msrb.mxu1 %v1443_v49 }
  0xe9   :  { %513 = vmatpush.bf16.msra.mxu3 %v1507_v6 }
  0xea   :  { %584 = vmatpush.bf16.msrb.mxu0 %v1467_v57  ;;  %597 = vmatpush.bf16.msrb.mxu1 %v1471_v58 }
  0xed   :  { %514 = vmatpush.bf16.msra.mxu3 %v1521_v13 }
  0xee   :  { %585 = vmatpush.bf16.msrb.mxu0 %v1495_v2  ;;  %598 = vmatpush.bf16.msrb.mxu1 %v1504_v5 }
 0x14d   :  { %v309_v25 = vpop.f32.mrf.mxu0 }
 0x14e   :  { %v350_v27 = vadd.f32 %v1088_v4, %v309_v25  ;;  %v322_v28 = vpop.f32.mrf.mxu1 }
 0x14f   :  { %v370_v8 = vadd.f32 %v1589_v45, %v322_v28 }
 0x150   :  { %v1091_v29 = vmul.f32 -1.442695, %v350_v27 }
 0x152   :  { %1165 = vpow2.f32 %v1091_v29 }
 0x153   :  { %v296_v33 = vpop.f32.mrf.mxu3 }
 0x154   :  { %v330_v34 = vadd.f32 %v1087_v32, %v296_v33 }
 0x155   :  { %v311_v36 = vpop.f32.mrf.mxu0 }
 0x156   :  { %v1090_v37 = vmul.f32 -1.442695, %v330_v34  ;;  %v324_v38 = vpop.f32.mrf.mxu1  ;;  %v1093_v36 = vld [vmem:[%s1830_s1 + $0x30] sm:$0xff] }
 0x158   :  { %v1166_v40 = vpop.eup %1165  ;;  %1167 = vpow2.f32 %v1090_v37  ;;  %v1094_v37 = vld [vmem:[%s1830_s1 + $0x38] sm:$0xff] }
 0x159   :  { %v354_v41 = vadd.f32 1.0, %v1166_v40 }
 0x15b   :  { %v298_v43 = vpop.f32.mrf.mxu3  ;;  %1169 = vrcp.f32 %v354_v41  ;;  %v366_v16 = vand.u32 2147483648, %v354_v41  ;;  %vm360_vm13 = vweird.f32 %v354_v41  ;;  %v364_v20 = vand.u32 2147483647, %v354_v41 }
 0x15d   :  { %v367_v4 = vor.u32 1.1754944e-38, %v366_v16  ;;  %vm365_vm15 = vcmp.eq.f32.partialorder %v364_v20, 8.507059e+37 }
 0x15e   :  { %v1168_v46 = vpop.eup %1167 }
 0x15f   :  { %v334_v47 = vadd.f32 1.0, %v1168_v46 }
 0x161   :  { %1171 = vrcp.f32 %v334_v47  ;;  %v1170_v50 = vpop.eup %1169  ;;  %v346_v59 = vand.u32 2147483648, %v334_v47  ;;  %v344_v61 = vand.u32 2147483647, %v334_v47  ;;  %vm340_vm9 = vweird.f32 %v334_v47 }
 0x162   :  { %v356_v51 = vmul.f32 %v1170_v50, %v354_v41  ;;  %vm361_vm12 = vweird.f32 %v1170_v50 }
 0x163   :  { %v347_v1 = vor.u32 1.1754944e-38, %v346_v59  ;;  %vm345_vm11 = vcmp.eq.f32.partialorder %v344_v61, 8.507059e+37  ;;  %vm362_vm14 = vmor %vm360_vm13, %vm361_vm12 }
 0x164   :  { %v357_v55 = vsub.f32 1.0, %v356_v51 }
 0x166   :  { %v358_v63 = vmul.f32 %v1170_v50, %v357_v55 }
 0x167   :  { %v1172_v52 = vpop.eup %1171 }
 0x168   :  { %v336_v54 = vmul.f32 %v1172_v52, %v334_v47  ;;  %vm341_vm8 = vweird.f32 %v1172_v52  ;;  %v359_v15 = vadd.f32 %v1170_v50, %v358_v63 }
 0x169   :  { %vm342_vm10 = vmor %vm340_vm9, %vm341_vm8 }
 0x16a   :  { %v337_v56 = vsub.f32 1.0, %v336_v54  ;;  %v363_v24 = vsel %vm362_vm14, %v1170_v50, %v359_v15 }
 0x16b   :  { %v368_v25 = vsel %vm365_vm15, %v367_v4, %v363_v24  ;;  %v1095_v4 = vld [vmem:[%s1830_s1 + $0x40] sm:$0xff] }
 0x16c   :  { %v338_v60 = vmul.f32 %v1172_v52, %v337_v56  ;;  %v374_v27 = vsub.f32 1.0, %v368_v25  ;;  %v376_v32 = vmul.f32 %v368_v25, %v1596_v23 }
 0x16e   :  { %v339_v0 = vadd.f32 %v1172_v52, %v338_v60 }
 0x170   :  { %v343_v9 = vsel %vm342_vm10, %v1172_v52, %v339_v0 }
 0x171   :  { %v348_v12 = vsel %vm345_vm11, %v347_v1, %v343_v9 }
 0x172   :  { %v371_v17 = vmul.f32 %v370_v8, %v348_v12 }
 0x174   :  { %v372_v21 = vadd.f32 %v1089_v14, %v371_v17 }
 0x176   :  { %1173 = vtanh.f32 %v372_v21 }
 0x17c   :  { %v1174_v28 = vpop.eup %1173 }
 0x17d   :  { %v375_v29 = vmul.f32 %v1174_v28, %v374_v27 }
 0x17f   :  { %v1638_v33 = vadd.f32 %v376_v32, %v375_v29 }
 0x181   :  { %v379_v34 = vpack.c.bf16 %v1638_v33, %v1638_v33 }
 0x183   :  { %1092 = vst [vmem:[%s1833_s4 + $0x4] sm:$0xf] %v379_v34  ;;  %392 = vmatmul.bf16.vlgmr.msrb.gmra.mxu2 %v379_v34  ;;  %405 = vmatmul.bf16.vlgmr.msrb.gmra.mxu3 %v379_v34 }
 0x184   :  { %418 = vmatmul.bf16.vlgmr.msra.gmra.mxu0 %v379_v34  ;;  %604 = vmatpush.bf16.msrb.mxu2 %v1346_v18 }
 0x185   :  { %675 = vmatpush.bf16.msrb.mxu3 %v1302_v3  ;;  %688 = vmatpush.bf16.msra.mxu0 %v1313_v7 }
 0x188   :  { %605 = vmatpush.bf16.msrb.mxu2 %v1371_v26 }
 0x189   :  { %676 = vmatpush.bf16.msrb.mxu3 %v1322_v10  ;;  %689 = vmatpush.bf16.msra.mxu0 %v1326_v11 }
 0x18c   :  { %606 = vmatpush.bf16.msrb.mxu2 %v1399_v35 }
 0x18d   :  { %677 = vmatpush.bf16.msrb.mxu3 %v1349_v19  ;;  %690 = vmatpush.bf16.msra.mxu0 %v1359_v22 }
 0x190   :  { %607 = vmatpush.bf16.msrb.mxu2 %v1427_v44 }
 0x191   :  { %678 = vmatpush.bf16.msrb.mxu3 %v1383_v30  ;;  %691 = vmatpush.bf16.msra.mxu0 %v1387_v31 }
 0x194   :  { %608 = vmatpush.bf16.msrb.mxu2 %v1455_v53 }
 0x195   :  { %679 = vmatpush.bf16.msrb.mxu3 %v1411_v39  ;;  %692 = vmatpush.bf16.msra.mxu0 %v1421_v42 }
 0x198   :  { %609 = vmatpush.bf16.msrb.mxu2 %v1483_v62 }
 0x199   :  { %680 = vmatpush.bf16.msrb.mxu3 %v1439_v48  ;;  %693 = vmatpush.bf16.msra.mxu0 %v1443_v49 }
 0x19c   :  { %610 = vmatpush.bf16.msrb.mxu2 %v1507_v6 }
 0x19d   :  { %681 = vmatpush.bf16.msrb.mxu3 %v1467_v57  ;;  %694 = vmatpush.bf16.msra.mxu0 %v1471_v58 }
 0x1a0   :  { %611 = vmatpush.bf16.msrb.mxu2 %v1521_v13 }
 0x1a1   :  { %682 = vmatpush.bf16.msrb.mxu3 %v1495_v2  ;;  %695 = vmatpush.bf16.msra.mxu0 %v1504_v5 }
 0x201   :  { %v419_v23 = vpop.f32.mrf.mxu0 }
 0x202   :  { %v467_v20 = vadd.f32 %v1589_v45, %v419_v23 }
 0x206   :  { %v393_v38 = vpop.f32.mrf.mxu2  ;;  %v406_v40 = vpop.f32.mrf.mxu3 }
 0x207   :  { %v427_v41 = vadd.f32 %v1093_v36, %v393_v38  ;;  %v447_v43 = vadd.f32 %v1094_v37, %v406_v40 }
 0x209   :  { %v1096_v46 = vmul.f32 -1.442695, %v427_v41  ;;  %v1097_v47 = vmul.f32 -1.442695, %v447_v43  ;;  %v421_v50 = vpop.f32.mrf.mxu0 }
 0x20b   :  { %1175 = vpow2.f32 %v1096_v46 }
 0x20c   :  { %1177 = vpow2.f32 %v1097_v47 }
 0x20e   :  { %v395_v51 = vpop.f32.mrf.mxu2  ;;  %v408_v52 = vpop.f32.mrf.mxu3 }
 0x20f   :  { %v1100_v52 = vld [vmem:[%s1830_s1 + $0x50] sm:$0xff] }
 0x211   :  { %v1176_v54 = vpop.eup %1175 }
 0x212   :  { %v1178_v55 = vpop.eup %1177  ;;  %v431_v56 = vadd.f32 1.0, %v1176_v54 }
 0x213   :  { %v451_v59 = vadd.f32 1.0, %v1178_v55 }
 0x214   :  { %1179 = vrcp.f32 %v431_v56  ;;  %v443_v8 = vand.u32 2147483648, %v431_v56  ;;  %v441_v14 = vand.u32 2147483647, %v431_v56  ;;  %vm437_vm1 = vweird.f32 %v431_v56 }
 0x215   :  { %1181 = vrcp.f32 %v451_v59  ;;  %v463_v28 = vand.u32 2147483648, %v451_v59  ;;  %vm457_vm5 = vweird.f32 %v451_v59  ;;  %v461_v29 = vand.u32 2147483647, %v451_v59 }
 0x216   :  { %v444_v17 = vor.u32 1.1754944e-38, %v443_v8  ;;  %vm442_vm3 = vcmp.eq.f32.partialorder %v441_v14, 8.507059e+37 }
 0x217   :  { %v464_v36 = vor.u32 1.1754944e-38, %v463_v28  ;;  %vm462_vm7 = vcmp.eq.f32.partialorder %v461_v29, 8.507059e+37 }
 0x21a   :  { %v1180_v60 = vpop.eup %1179 }
 0x21b   :  { %v1182_v61 = vpop.eup %1181  ;;  %v433_v63 = vmul.f32 %v1180_v60, %v431_v56  ;;  %vm438_vm0 = vweird.f32 %v1180_v60 }
 0x21c   :  { %v453_v0 = vmul.f32 %v1182_v61, %v451_v59  ;;  %vm439_vm2 = vmor %vm437_vm1, %vm438_vm0  ;;  %vm458_vm4 = vweird.f32 %v1182_v61 }
 0x21d   :  { %v434_v1 = vsub.f32 1.0, %v433_v63  ;;  %vm459_vm6 = vmor %vm457_vm5, %vm458_vm4 }
 0x21e   :  { %v454_v9 = vsub.f32 1.0, %v453_v0 }
 0x21f   :  { %v435_v12 = vmul.f32 %v1180_v60, %v434_v1 }
 0x220   :  { %v455_v15 = vmul.f32 %v1182_v61, %v454_v9 }
 0x221   :  { %v436_v16 = vadd.f32 %v1180_v60, %v435_v12 }
 0x222   :  { %v456_v25 = vadd.f32 %v1182_v61, %v455_v15 }
 0x223   :  { %v440_v21 = vsel %vm439_vm2, %v1180_v60, %v436_v16 }
 0x224   :  { %v445_v24 = vsel %vm442_vm3, %v444_v17, %v440_v21  ;;  %v460_v34 = vsel %vm459_vm6, %v1182_v61, %v456_v25 }
 0x225   :  { %v468_v27 = vmul.f32 %v467_v20, %v445_v24  ;;  %v465_v23 = vsel %vm462_vm7, %v464_v36, %v460_v34 }
 0x226   :  { %v471_v37 = vsub.f32 1.0, %v465_v23  ;;  %v473_v41 = vmul.f32 %v465_v23, %v1638_v33  ;;  %v1099_v33 = vld [vmem:[%s1830_s1 + $0x48] sm:$0xff] }
 0x227   :  { %v469_v32 = vadd.f32 %v1095_v4, %v468_v27 }
 0x229   :  { %1183 = vtanh.f32 %v469_v32  ;;  %v1101_v32 = vld [vmem:[%s1830_s1 + $0x58] sm:$0xff] }
 0x22f   :  { %v1184_v38 = vpop.eup %1183 }
 0x230   :  { %v472_v40 = vmul.f32 %v1184_v38, %v471_v37 }
 0x232   :  { %v1680_v43 = vadd.f32 %v473_v41, %v472_v40 }
 0x234   :  { %v476_v46 = vpack.c.bf16 %v1680_v43, %v1680_v43 }
 0x236   :  { %1098 = vst [vmem:[%s1833_s4 + $0x8] sm:$0xf] %v476_v46  ;;  %489 = vmatmul.bf16.vlgmr.msra.gmra.mxu1 %v476_v46  ;;  %502 = vmatmul.bf16.vlgmr.msra.gmra.mxu2 %v476_v46 }
 0x237   :  { %515 = vmatmul.bf16.vlgmr.msra.gmra.mxu3 %v476_v46  ;;  %701 = vmatpush.bf16.msra.mxu1 %v1346_v18 }
 0x238   :  { %772 = vmatpush.bf16.msra.mxu2 %v1302_v3  ;;  %785 = vmatpush.bf16.msra.mxu3 %v1313_v7 }
 0x23b   :  { %702 = vmatpush.bf16.msra.mxu1 %v1371_v26 }
 0x23c   :  { %773 = vmatpush.bf16.msra.mxu2 %v1322_v10  ;;  %786 = vmatpush.bf16.msra.mxu3 %v1326_v11 }
 0x23f   :  { %703 = vmatpush.bf16.msra.mxu1 %v1399_v35 }
 0x240   :  { %774 = vmatpush.bf16.msra.mxu2 %v1349_v19  ;;  %787 = vmatpush.bf16.msra.mxu3 %v1359_v22 }
 0x243   :  { %704 = vmatpush.bf16.msra.mxu1 %v1427_v44 }
 0x244   :  { %775 = vmatpush.bf16.msra.mxu2 %v1383_v30  ;;  %788 = vmatpush.bf16.msra.mxu3 %v1387_v31 }
 0x247   :  { %705 = vmatpush.bf16.msra.mxu1 %v1455_v53 }
 0x248   :  { %776 = vmatpush.bf16.msra.mxu2 %v1411_v39  ;;  %789 = vmatpush.bf16.msra.mxu3 %v1421_v42 }
 0x24b   :  { %706 = vmatpush.bf16.msra.mxu1 %v1483_v62 }
 0x24c   :  { %777 = vmatpush.bf16.msra.mxu2 %v1439_v48  ;;  %790 = vmatpush.bf16.msra.mxu3 %v1443_v49 }
 0x24f   :  { %707 = vmatpush.bf16.msra.mxu1 %v1507_v6 }
 0x250   :  { %778 = vmatpush.bf16.msra.mxu2 %v1467_v57  ;;  %791 = vmatpush.bf16.msra.mxu3 %v1471_v58 }
 0x253   :  { %708 = vmatpush.bf16.msra.mxu1 %v1521_v13 }
 0x254   :  { %779 = vmatpush.bf16.msra.mxu2 %v1495_v2  ;;  %792 = vmatpush.bf16.msra.mxu3 %v1504_v5 }
 0x2b3   :  { %v490_v47 = vpop.f32.mrf.mxu1 }
 0x2b4   :  { %v524_v50 = vadd.f32 %v1099_v33, %v490_v47 }
 0x2b6   :  { %v1102_v51 = vmul.f32 -1.442695, %v524_v50 }
 0x2b8   :  { %1185 = vpow2.f32 %v1102_v51 }
 0x2b9   :  { %v503_v54 = vpop.f32.mrf.mxu2 }
 0x2ba   :  { %v544_v55 = vadd.f32 %v1100_v52, %v503_v54  ;;  %v516_v56 = vpop.f32.mrf.mxu3 }
 0x2bb   :  { %v492_v59 = vpop.f32.mrf.mxu1  ;;  %v564_v29 = vadd.f32 %v1589_v45, %v516_v56 }
 0x2bc   :  { %v1103_v60 = vmul.f32 -1.442695, %v544_v55 }
 0x2be   :  { %v1186_v61 = vpop.eup %1185  ;;  %1187 = vpow2.f32 %v1103_v60 }
 0x2bf   :  { %v528_v63 = vadd.f32 1.0, %v1186_v61 }
 0x2c1   :  { %1189 = vrcp.f32 %v528_v63  ;;  %v505_v0 = vpop.f32.mrf.mxu2  ;;  %v540_v16 = vand.u32 2147483648, %v528_v63  ;;  %v538_v20 = vand.u32 2147483647, %v528_v63  ;;  %vm534_vm9 = vweird.f32 %v528_v63 }
 0x2c2   :  { %v518_v1 = vpop.f32.mrf.mxu3 }
 0x2c3   :  { %v541_v25 = vor.u32 1.1754944e-38, %v540_v16  ;;  %vm539_vm11 = vcmp.eq.f32.partialorder %v538_v20, 8.507059e+37  ;;  %v1107_v20 = vld [vmem:[%s1830_s1 + $0x70] sm:$0xff] }
 0x2c4   :  { %v1188_v8 = vpop.eup %1187 }
 0x2c5   :  { %v548_v9 = vadd.f32 1.0, %v1188_v8 }
 0x2c7   :  { %v1190_v12 = vpop.eup %1189  ;;  %1191 = vrcp.f32 %v548_v9  ;;  %v560_v23 = vand.u32 2147483648, %v548_v9  ;;  %v558_v38 = vand.u32 2147483647, %v548_v9  ;;  %vm554_vm13 = vweird.f32 %v548_v9 }
 0x2c8   :  { %v530_v14 = vmul.f32 %v1190_v12, %v528_v63  ;;  %vm535_vm8 = vweird.f32 %v1190_v12 }
 0x2c9   :  { %vm536_vm10 = vmor %vm534_vm9, %vm535_vm8  ;;  %v561_v46 = vor.u32 1.1754944e-38, %v560_v23  ;;  %vm559_vm15 = vcmp.eq.f32.partialorder %v558_v38, 8.507059e+37 }
 0x2ca   :  { %v531_v15 = vsub.f32 1.0, %v530_v14 }
 0x2cc   :  { %v532_v17 = vmul.f32 %v1190_v12, %v531_v15 }
 0x2cd   :  { %v1192_v21 = vpop.eup %1191 }
 0x2ce   :  { %v550_v24 = vmul.f32 %v1192_v21, %v548_v9  ;;  %v533_v4 = vadd.f32 %v1190_v12, %v532_v17  ;;  %vm555_vm12 = vweird.f32 %v1192_v21 }
 0x2cf   :  { %vm556_vm14 = vmor %vm554_vm13, %vm555_vm12 }
 0x2d0   :  { %v551_v27 = vsub.f32 1.0, %v550_v24  ;;  %v537_v28 = vsel %vm536_vm10, %v1190_v12, %v533_v4 }
 0x2d1   :  { %v542_v34 = vsel %vm539_vm11, %v541_v25, %v537_v28 }
 0x2d2   :  { %v552_v36 = vmul.f32 %v1192_v21, %v551_v27  ;;  %v565_v37 = vmul.f32 %v564_v29, %v542_v34 }
 0x2d4   :  { %v566_v40 = vadd.f32 %v1101_v32, %v565_v37  ;;  %v553_v41 = vadd.f32 %v1192_v21, %v552_v36 }
 0x2d6   :  { %1193 = vtanh.f32 %v566_v40  ;;  %v557_v33 = vsel %vm556_vm14, %v1192_v21, %v553_v41 }
 0x2d7   :  { %v562_v47 = vsel %vm559_vm15, %v561_v46, %v557_v33  ;;  %v1112_v46 = vld [vmem:[%s1830_s1 + $0x80] sm:$0xff] }
 0x2d8   :  { %v568_v50 = vsub.f32 1.0, %v562_v47  ;;  %v570_v54 = vmul.f32 %v562_v47, %v1680_v43 }
 0x2dc   :  { %v1194_v51 = vpop.eup %1193 }
 0x2dd   :  { %v569_v52 = vmul.f32 %v1194_v51, %v568_v50 }
 0x2df   :  { %v1722_v55 = vadd.f32 %v570_v54, %v569_v52 }
 0x2e1   :  { %v573_v56 = vpack.c.bf16 %v1722_v55, %v1722_v55 }
 0x2e3   :  { %1104 = vst [vmem:[%s1833_s4 + $0xc] sm:$0xf] %v573_v56  ;;  %586 = vmatmul.bf16.vlgmr.msrb.gmra.mxu0 %v573_v56  ;;  %599 = vmatmul.bf16.vlgmr.msrb.gmra.mxu1 %v573_v56 }
 0x2e4   :  { %612 = vmatmul.bf16.vlgmr.msrb.gmra.mxu2 %v573_v56  ;;  %798 = vmatpush.bf16.msrb.mxu0 %v1346_v18 }
 0x2e5   :  { %869 = vmatpush.bf16.msrb.mxu1 %v1302_v3  ;;  %882 = vmatpush.bf16.msrb.mxu2 %v1313_v7  ;;  %v1105_v3 = vld [vmem:[%s1830_s1 + $0x60] sm:$0xff]  ;;  %v1106_v7 = vld [vmem:[%s1830_s1 + $0x68] sm:$0xff] }
 0x2e8   :  { %799 = vmatpush.bf16.msrb.mxu0 %v1371_v26 }
 0x2e9   :  { %870 = vmatpush.bf16.msrb.mxu1 %v1322_v10  ;;  %883 = vmatpush.bf16.msrb.mxu2 %v1326_v11 }
 0x2ec   :  { %800 = vmatpush.bf16.msrb.mxu0 %v1399_v35 }
 0x2ed   :  { %871 = vmatpush.bf16.msrb.mxu1 %v1349_v19  ;;  %884 = vmatpush.bf16.msrb.mxu2 %v1359_v22 }
 0x2f0   :  { %801 = vmatpush.bf16.msrb.mxu0 %v1427_v44 }
 0x2f1   :  { %872 = vmatpush.bf16.msrb.mxu1 %v1383_v30  ;;  %885 = vmatpush.bf16.msrb.mxu2 %v1387_v31 }
 0x2f4   :  { %802 = vmatpush.bf16.msrb.mxu0 %v1455_v53 }
 0x2f5   :  { %873 = vmatpush.bf16.msrb.mxu1 %v1411_v39  ;;  %886 = vmatpush.bf16.msrb.mxu2 %v1421_v42 }
 0x2f8   :  { %803 = vmatpush.bf16.msrb.mxu0 %v1483_v62 }
 0x2f9   :  { %874 = vmatpush.bf16.msrb.mxu1 %v1439_v48  ;;  %887 = vmatpush.bf16.msrb.mxu2 %v1443_v49 }
 0x2fc   :  { %804 = vmatpush.bf16.msrb.mxu0 %v1507_v6 }
 0x2fd   :  { %875 = vmatpush.bf16.msrb.mxu1 %v1467_v57  ;;  %888 = vmatpush.bf16.msrb.mxu2 %v1471_v58 }
 0x300   :  { %805 = vmatpush.bf16.msrb.mxu0 %v1521_v13 }
 0x301   :  { %876 = vmatpush.bf16.msrb.mxu1 %v1495_v2  ;;  %889 = vmatpush.bf16.msrb.mxu2 %v1504_v5 }
 0x360   :  { %v587_v10 = vpop.f32.mrf.mxu0  ;;  %v600_v11 = vpop.f32.mrf.mxu1 }
 0x361   :  { %v621_v19 = vadd.f32 %v1105_v3, %v587_v10  ;;  %v641_v22 = vadd.f32 %v1106_v7, %v600_v11 }
 0x363   :  { %v1108_v30 = vmul.f32 -1.442695, %v621_v19  ;;  %v1109_v31 = vmul.f32 -1.442695, %v641_v22 }
 0x365   :  { %1195 = vpow2.f32 %v1108_v30 }
 0x366   :  { %1197 = vpow2.f32 %v1109_v31 }
 0x367   :  { %v613_v39 = vpop.f32.mrf.mxu2 }
 0x368   :  { %v589_v42 = vpop.f32.mrf.mxu0  ;;  %v602_v48 = vpop.f32.mrf.mxu1  ;;  %v661_v17 = vadd.f32 %v1589_v45, %v613_v39 }
 0x36b   :  { %v1196_v49 = vpop.eup %1195 }
 0x36c   :  { %v1198_v57 = vpop.eup %1197  ;;  %v625_v58 = vadd.f32 1.0, %v1196_v49 }
 0x36d   :  { %v645_v2 = vadd.f32 1.0, %v1198_v57 }
 0x36e   :  { %1199 = vrcp.f32 %v625_v58  ;;  %v637_v1 = vand.u32 2147483648, %v625_v58  ;;  %v635_v9 = vand.u32 2147483647, %v625_v58  ;;  %vm631_vm1 = vweird.f32 %v625_v58 }
 0x36f   :  { %1201 = vrcp.f32 %v645_v2  ;;  %v615_v5 = vpop.f32.mrf.mxu2  ;;  %v657_v4 = vand.u32 2147483648, %v645_v2  ;;  %vm651_vm5 = vweird.f32 %v645_v2  ;;  %v655_v27 = vand.u32 2147483647, %v645_v2 }
 0x370   :  { %v638_v15 = vor.u32 1.1754944e-38, %v637_v1  ;;  %vm636_vm3 = vcmp.eq.f32.partialorder %v635_v9, 8.507059e+37 }
 0x371   :  { %v658_v32 = vor.u32 1.1754944e-38, %v657_v4  ;;  %vm656_vm7 = vcmp.eq.f32.partialorder %v655_v27, 8.507059e+37 }
 0x374   :  { %v1200_v43 = vpop.eup %1199 }
 0x375   :  { %v1202_v59 = vpop.eup %1201  ;;  %v627_v60 = vmul.f32 %v1200_v43, %v625_v58  ;;  %vm632_vm0 = vweird.f32 %v1200_v43 }
 0x376   :  { %v647_v61 = vmul.f32 %v1202_v59, %v645_v2  ;;  %vm633_vm2 = vmor %vm631_vm1, %vm632_vm0  ;;  %vm652_vm4 = vweird.f32 %v1202_v59  ;;  %v1113_v2 = vld [vmem:[%s1830_s1 + $0x88] sm:$0xff] }
 0x377   :  { %v628_v63 = vsub.f32 1.0, %v627_v60  ;;  %vm653_vm6 = vmor %vm651_vm5, %vm652_vm4 }
 0x378   :  { %v648_v0 = vsub.f32 1.0, %v647_v61 }
 0x379   :  { %v629_v8 = vmul.f32 %v1200_v43, %v628_v63 }
 0x37a   :  { %v649_v12 = vmul.f32 %v1202_v59, %v648_v0 }
 0x37b   :  { %v630_v14 = vadd.f32 %v1200_v43, %v629_v8 }
 0x37c   :  { %v650_v24 = vadd.f32 %v1202_v59, %v649_v12 }
 0x37d   :  { %v634_v16 = vsel %vm633_vm2, %v1200_v43, %v630_v14 }
 0x37e   :  { %v639_v21 = vsel %vm636_vm3, %v638_v15, %v634_v16  ;;  %v654_v29 = vsel %vm653_vm6, %v1202_v59, %v650_v24 }
 0x37f   :  { %v662_v25 = vmul.f32 %v661_v17, %v639_v21  ;;  %v659_v34 = vsel %vm656_vm7, %v658_v32, %v654_v29  ;;  %v1118_v21 = vld [vmem:[%s1830_s1 + $0x98] sm:$0xff] }
 0x380   :  { %v665_v36 = vsub.f32 1.0, %v659_v34  ;;  %v667_v38 = vmul.f32 %v659_v34, %v1722_v55 }
 0x381   :  { %v663_v28 = vadd.f32 %v1107_v20, %v662_v25  ;;  %v1117_v20 = vld [vmem:[%s1830_s1 + $0x90] sm:$0xff] }
 0x383   :  { %1203 = vtanh.f32 %v663_v28 }
 0x389   :  { %v1204_v23 = vpop.eup %1203 }
 0x38a   :  { %v666_v37 = vmul.f32 %v1204_v23, %v665_v36 }
 0x38c   :  { %v1764_v40 = vadd.f32 %v667_v38, %v666_v37 }
 0x38e   :  { %v670_v41 = vpack.c.bf16 %v1764_v40, %v1764_v40 }
 0x390   :  { %1110 = vst [vmem:[%s1833_s4 + $0x10] sm:$0xf] %v670_v41  ;;  %683 = vmatmul.bf16.vlgmr.msrb.gmra.mxu3 %v670_v41  ;;  %696 = vmatmul.bf16.vlgmr.msra.gmra.mxu0 %v670_v41 }
 0x391   :  { %709 = vmatmul.bf16.vlgmr.msra.gmra.mxu1 %v670_v41  ;;  %895 = vmatpush.bf16.msrb.mxu3 %v1346_v18 }
 0x395   :  { %896 = vmatpush.bf16.msrb.mxu3 %v1371_v26 }
 0x399   :  { %897 = vmatpush.bf16.msrb.mxu3 %v1399_v35  ;;  %v1111_v35 = vld [vmem:[%s1830_s1 + $0x78] sm:$0xff] }
 0x39d   :  { %898 = vmatpush.bf16.msrb.mxu3 %v1427_v44 }
 0x3a1   :  { %899 = vmatpush.bf16.msrb.mxu3 %v1455_v53 }
 0x3a5   :  { %900 = vmatpush.bf16.msrb.mxu3 %v1483_v62 }
 0x3a9   :  { %901 = vmatpush.bf16.msrb.mxu3 %v1507_v6 }
 0x3ad   :  { %902 = vmatpush.bf16.msrb.mxu3 %v1521_v13 }
 0x40d   :  { %v697_v33 = vpop.f32.mrf.mxu0 }
 0x40e   :  { %v738_v18 = vadd.f32 %v1112_v46, %v697_v33  ;;  %v710_v47 = vpop.f32.mrf.mxu1 }
 0x40f   :  { %v758_v49 = vadd.f32 %v1589_v45, %v710_v47 }
 0x410   :  { %v1115_v26 = vmul.f32 -1.442695, %v738_v18 }
 0x412   :  { %1205 = vpow2.f32 %v1115_v26 }
 0x413   :  { %v684_v44 = vpop.f32.mrf.mxu3 }
 0x414   :  { %v718_v53 = vadd.f32 %v1111_v35, %v684_v44 }
 0x415   :  { %v699_v62 = vpop.f32.mrf.mxu0 }
 0x416   :  { %v1114_v50 = vmul.f32 -1.442695, %v718_v53  ;;  %v712_v6 = vpop.f32.mrf.mxu1 }
 0x418   :  { %v1206_v51 = vpop.eup %1205  ;;  %1207 = vpow2.f32 %v1114_v50 }
 0x419   :  { %v742_v13 = vadd.f32 1.0, %v1206_v51 }
 0x41b   :  { %v686_v52 = vpop.f32.mrf.mxu3  ;;  %1209 = vrcp.f32 %v742_v13  ;;  %v754_v43 = vand.u32 2147483648, %v742_v13  ;;  %vm748_vm13 = vweird.f32 %v742_v13  ;;  %v752_v60 = vand.u32 2147483647, %v742_v13 }
 0x41d   :  { %v755_v0 = vor.u32 1.1754944e-38, %v754_v43  ;;  %vm753_vm15 = vcmp.eq.f32.partialorder %v752_v60, 8.507059e+37 }
 0x41e   :  { %v1208_v54 = vpop.eup %1207 }
 0x41f   :  { %v722_v55 = vadd.f32 1.0, %v1208_v54  ;;  %v1119_v54 = vld [vmem:[%s1830_s1 + $0xa0] sm:$0xff] }
 0x421   :  { %1211 = vrcp.f32 %v722_v55  ;;  %v1210_v56 = vpop.eup %1209  ;;  %v734_v22 = vand.u32 2147483648, %v722_v55  ;;  %v732_v31 = vand.u32 2147483647, %v722_v55  ;;  %vm728_vm9 = vweird.f32 %v722_v55 }
 0x422   :  { %v744_v3 = vmul.f32 %v1210_v56, %v742_v13  ;;  %vm749_vm12 = vweird.f32 %v1210_v56 }
 0x423   :  { %v735_v48 = vor.u32 1.1754944e-38, %v734_v22  ;;  %vm733_vm11 = vcmp.eq.f32.partialorder %v732_v31, 8.507059e+37  ;;  %vm750_vm14 = vmor %vm748_vm13, %vm749_vm12 }
 0x424   :  { %v745_v11 = vsub.f32 1.0, %v744_v3 }
 0x426   :  { %v746_v39 = vmul.f32 %v1210_v56, %v745_v11 }
 0x427   :  { %v1212_v7 = vpop.eup %1211 }
 0x428   :  { %v724_v10 = vmul.f32 %v1212_v7, %v722_v55  ;;  %vm729_vm8 = vweird.f32 %v1212_v7  ;;  %v747_v5 = vadd.f32 %v1210_v56, %v746_v39 }
 0x429   :  { %vm730_vm10 = vmor %vm728_vm9, %vm729_vm8 }
 0x42a   :  { %v725_v19 = vsub.f32 1.0, %v724_v10  ;;  %v751_v63 = vsel %vm750_vm14, %v1210_v56, %v747_v5  ;;  %v1124_v5 = vld [vmem:[%s1830_s1 + $0xb0] sm:$0xff] }
 0x42b   :  { %v756_v1 = vsel %vm753_vm15, %v755_v0, %v751_v63 }
 0x42c   :  { %v726_v30 = vmul.f32 %v1212_v7, %v725_v19  ;;  %v762_v8 = vsub.f32 1.0, %v756_v1  ;;  %v764_v14 = vmul.f32 %v756_v1, %v1764_v40 }
 0x42e   :  { %v727_v42 = vadd.f32 %v1212_v7, %v726_v30 }
 0x430   :  { %v731_v57 = vsel %vm730_vm10, %v1212_v7, %v727_v42 }
 0x431   :  { %v736_v58 = vsel %vm733_vm11, %v735_v48, %v731_v57 }
 0x432   :  { %v759_v59 = vmul.f32 %v758_v49, %v736_v58  ;;  %v1123_v49 = vld [vmem:[%s1830_s1 + $0xa8] sm:$0xff] }
 0x434   :  { %v760_v61 = vadd.f32 %v1113_v2, %v759_v59 }
 0x436   :  { %1213 = vtanh.f32 %v760_v61 }
 0x43c   :  { %v1214_v9 = vpop.eup %1213 }
 0x43d   :  { %v763_v12 = vmul.f32 %v1214_v9, %v762_v8 }
 0x43f   :  { %v765_v15 = vadd.f32 %v764_v14, %v763_v12 }
 0x441   :  { %v767_v16 = vpack.c.bf16 %v765_v15, %v765_v15 }
 0x443   :  { %1116 = vst [vmem:[%s1833_s4 + $0x14] sm:$0xf] %v767_v16  ;;  %780 = vmatmul.bf16.vlgmr.msra.gmra.mxu2 %v767_v16  ;;  %793 = vmatmul.bf16.vlgmr.msra.gmra.mxu3 %v767_v16 }
 0x444   :  { %806 = vmatmul.bf16.vlgmr.msrb.gmra.mxu0 %v767_v16 }
 0x4c1   :  { %v807_v17 = vpop.f32.mrf.mxu0 }
 0x4c2   :  { %v855_v51 = vadd.f32 %v1589_v45, %v807_v17 }
 0x4c6   :  { %v781_v24 = vpop.f32.mrf.mxu2  ;;  %v794_v4 = vpop.f32.mrf.mxu3 }
 0x4c7   :  { %v815_v25 = vadd.f32 %v1117_v20, %v781_v24  ;;  %v835_v27 = vadd.f32 %v1118_v21, %v794_v4 }
 0x4c9   :  { %v1120_v28 = vmul.f32 -1.442695, %v815_v25  ;;  %v1121_v29 = vmul.f32 -1.442695, %v835_v27  ;;  %v809_v32 = vpop.f32.mrf.mxu0 }
 0x4cb   :  { %1215 = vpow2.f32 %v1120_v28 }
 0x4cc   :  { %1217 = vpow2.f32 %v1121_v29 }
 0x4ce   :  { %v783_v34 = vpop.f32.mrf.mxu2  ;;  %v796_v36 = vpop.f32.mrf.mxu3 }
 0x4cf   :  { %v1235_v34 = vld [vmem:[%s1832_s3] ss:$0 sm:$0xff]  ;;  %s1262_s3 = smov [#allocation3]  }
 0x4d0   :  { %s976_s26 = sshll.u32 %s1262_s3, 4  ;;  %s977_s26 = int_to_ptr.vmem [resolvable:$true] %s976_s26 }
 0x4d1   :  { %v1216_v23 = vpop.eup %1215 }
 0x4d2   :  { %v1218_v37 = vpop.eup %1217  ;;  %v819_v38 = vadd.f32 1.0, %v1216_v23  ;;  %v1125_v23 = vld [vmem:[%s1830_s1 + $0xb8] sm:$0xff] }
 0x4d3   :  { %v839_v40 = vadd.f32 1.0, %v1218_v37 }
 0x4d4   :  { %1219 = vrcp.f32 %v819_v38  ;;  %v831_v26 = vand.u32 2147483648, %v819_v38  ;;  %v829_v53 = vand.u32 2147483647, %v819_v38  ;;  %vm825_vm1 = vweird.f32 %v819_v38 }
 0x4d5   :  { %1221 = vrcp.f32 %v839_v40  ;;  %v851_v3 = vand.u32 2147483648, %v839_v40  ;;  %vm845_vm5 = vweird.f32 %v839_v40  ;;  %v849_v7 = vand.u32 2147483647, %v839_v40 }
 0x4d6   :  { %v832_v6 = vor.u32 1.1754944e-38, %v831_v26  ;;  %vm830_vm3 = vcmp.eq.f32.partialorder %v829_v53, 8.507059e+37 }
 0x4d7   :  { %v852_v19 = vor.u32 1.1754944e-38, %v851_v3  ;;  %vm850_vm7 = vcmp.eq.f32.partialorder %v849_v7, 8.507059e+37 }
 0x4da   :  { %v1220_v41 = vpop.eup %1219 }
 0x4db   :  { %v1222_v46 = vpop.eup %1221  ;;  %v821_v33 = vmul.f32 %v1220_v41, %v819_v38  ;;  %vm826_vm0 = vweird.f32 %v1220_v41 }
 0x4dc   :  { %v841_v18 = vmul.f32 %v1222_v46, %v839_v40  ;;  %vm827_vm2 = vmor %vm825_vm1, %vm826_vm0  ;;  %vm846_vm4 = vweird.f32 %v1222_v46 }
 0x4dd   :  { %v822_v47 = vsub.f32 1.0, %v821_v33  ;;  %vm847_vm6 = vmor %vm845_vm5, %vm846_vm4 }
 0x4de   :  { %v842_v35 = vsub.f32 1.0, %v841_v18 }
 0x4df   :  { %v823_v44 = vmul.f32 %v1220_v41, %v822_v47 }
 0x4e0   :  { %v843_v62 = vmul.f32 %v1222_v46, %v842_v35 }
 0x4e1   :  { %v824_v50 = vadd.f32 %v1220_v41, %v823_v44 }
 0x4e2   :  { %v844_v55 = vadd.f32 %v1222_v46, %v843_v62 }
 0x4e3   :  { %v828_v13 = vsel %vm827_vm2, %v1220_v41, %v824_v50 }
 0x4e4   :  { %v833_v52 = vsel %vm830_vm3, %v832_v6, %v828_v13  ;;  %v848_v11 = vsel %vm847_vm6, %v1222_v46, %v844_v55 }
 0x4e5   :  { %v856_v56 = vmul.f32 %v855_v51, %v833_v52  ;;  %v853_v45 = vsel %vm850_vm7, %v852_v19, %v848_v11 }
 0x4e6   :  { %v859_v22 = vsub.f32 1.0, %v853_v45  ;;  %v861_v39 = vmul.f32 %v853_v45, %v765_v15 }
 0x4e7   :  { %v857_v10 = vadd.f32 %v1119_v54, %v856_v56 }
 0x4e9   :  { %1223 = vtanh.f32 %v857_v10 }
 0x4ef   :  { %v1224_v30 = vpop.eup %1223 }
 0x4f0   :  { %v860_v31 = vmul.f32 %v1224_v30, %v859_v22 }
 0x4f2   :  { %v1803_v42 = vadd.f32 %v861_v39, %v860_v31 }
 0x4f4   :  { %v864_v48 = vpack.c.bf16 %v1803_v42, %v1803_v42 }
 0x4f6   :  { %1122 = vst [vmem:[%s1833_s4 + $0x18] sm:$0xf] %v864_v48  ;;  %877 = vmatmul.bf16.vlgmr.msrb.gmra.mxu1 %v864_v48  ;;  %890 = vmatmul.bf16.vlgmr.msrb.gmra.mxu2 %v864_v48 }
 0x4f7   :  { %903 = vmatmul.bf16.vlgmr.msrb.gmra.mxu3 %v864_v48 }
 0x573   :  { %v878_v57 = vpop.f32.mrf.mxu1 }
 0x574   :  { %v912_v58 = vadd.f32 %v1123_v49, %v878_v57 }
 0x576   :  { %v1126_v2 = vmul.f32 -1.442695, %v912_v58 }
 0x578   :  { %1225 = vpow2.f32 %v1126_v2 }
 0x579   :  { %v891_v43 = vpop.f32.mrf.mxu2 }
 0x57a   :  { %v932_v59 = vadd.f32 %v1124_v5, %v891_v43  ;;  %v904_v60 = vpop.f32.mrf.mxu3 }
 0x57b   :  { %v880_v61 = vpop.f32.mrf.mxu1  ;;  %v952_v36 = vadd.f32 %v1235_v34, %v904_v60 }
 0x57c   :  { %v1127_v63 = vmul.f32 -1.442695, %v932_v59 }
 0x57e   :  { %v1226_v0 = vpop.eup %1225  ;;  %1227 = vpow2.f32 %v1127_v63 }
 0x57f   :  { %v916_v1 = vadd.f32 1.0, %v1226_v0 }
 0x581   :  { %1229 = vrcp.f32 %v916_v1  ;;  %v893_v8 = vpop.f32.mrf.mxu2  ;;  %v928_v20 = vand.u32 2147483648, %v916_v1  ;;  %v926_v24 = vand.u32 2147483647, %v916_v1  ;;  %vm922_vm9 = vweird.f32 %v916_v1 }
 0x582   :  { %v906_v9 = vpop.f32.mrf.mxu3 }
 0x583   :  { %v929_v28 = vor.u32 1.1754944e-38, %v928_v20  ;;  %vm927_vm11 = vcmp.eq.f32.partialorder %v926_v24, 8.507059e+37 }
 0x584   :  { %v1228_v12 = vpop.eup %1227 }
 0x585   :  { %v936_v14 = vadd.f32 1.0, %v1228_v12 }
 0x587   :  { %v1230_v15 = vpop.eup %1229  ;;  %1231 = vrcp.f32 %v936_v14  ;;  %v948_v41 = vand.u32 2147483648, %v936_v14  ;;  %v946_v46 = vand.u32 2147483647, %v936_v14  ;;  %vm942_vm13 = vweird.f32 %v936_v14 }
 0x588   :  { %v918_v16 = vmul.f32 %v1230_v15, %v916_v1  ;;  %vm923_vm8 = vweird.f32 %v1230_v15 }
 0x589   :  { %vm924_vm10 = vmor %vm922_vm9, %vm923_vm8  ;;  %v949_v26 = vor.u32 1.1754944e-38, %v948_v41  ;;  %vm947_vm15 = vcmp.eq.f32.partialorder %v946_v46, 8.507059e+37 }
 0x58a   :  { %v919_v17 = vsub.f32 1.0, %v918_v16 }
 0x58c   :  { %v920_v21 = vmul.f32 %v1230_v15, %v919_v17 }
 0x58d   :  { %v1232_v4 = vpop.eup %1231 }
 0x58e   :  { %v938_v25 = vmul.f32 %v1232_v4, %v936_v14  ;;  %v921_v27 = vadd.f32 %v1230_v15, %v920_v21  ;;  %vm943_vm12 = vweird.f32 %v1232_v4 }
 0x58f   :  { %vm944_vm14 = vmor %vm942_vm13, %vm943_vm12 }
 0x590   :  { %v939_v29 = vsub.f32 1.0, %v938_v25  ;;  %v925_v32 = vsel %vm924_vm10, %v1230_v15, %v921_v27 }
 0x591   :  { %v930_v37 = vsel %vm927_vm11, %v929_v28, %v925_v32 }
 0x592   :  { %v953_v38 = vmul.f32 %v952_v36, %v930_v37  ;;  %v940_v40 = vmul.f32 %v1232_v4, %v939_v29 }
 0x594   :  { %v954_v33 = vadd.f32 %v1125_v23, %v953_v38  ;;  %v941_v18 = vadd.f32 %v1232_v4, %v940_v40 }
 0x596   :  { %1233 = vtanh.f32 %v954_v33  ;;  %v945_v47 = vsel %vm944_vm14, %v1232_v4, %v941_v18 }
 0x597   :  { %v950_v35 = vsel %vm947_vm15, %v949_v26, %v945_v47 }
 0x598   :  { %v956_v44 = vsub.f32 1.0, %v950_v35  ;;  %v958_v50 = vmul.f32 %v950_v35, %v1803_v42 }
 0x59c   :  { %v1234_v53 = vpop.eup %1233 }
 0x59d   :  { %v957_v62 = vmul.f32 %v1234_v53, %v956_v44 }
 0x59f   :  { %v959_v6 = vadd.f32 %v958_v50, %v957_v62 }
 0x5a1   :  { %v961_v51 = vpack.c.bf16 %v959_v6, %v959_v6  ;;  %968 = vst [vmem:[#allocation3] sm:$0xff] %v959_v6 }
 0x5a2   :  { %981 = dma.vmem_to_hbm [thread:$0]  %s977_s26, 128, %s979_s28, [#allocation4]  }
 0x5a3   :  { %1128 = vst [vmem:[%s1833_s4 + $0x1c] sm:$0xf] %v961_v51 }
 0x5a4   :  { %1260 = dma.done.wait [#allocation4], 128  }
 0x5a5   :  { %1261 = vsyncadd [#allocation4], 4294967168 }
 0x5a6   :  { %988 = vsyncpa [#allocation4], 1 }

</bundles_post_ra>
